<compile_context>
chip_gen: v7x
topology: tpu7x:2x2x1
jax: 0.10.0
libtpu: 0.0.40
codegen_flags: <defaults>
</compile_context>

<pallas_src>
import jax
import jax.numpy as jnp
from jax.experimental import pallas as pl
from jax.experimental.pallas import tpu as pltpu


def _activation_dtype():
    """bf16 VPU/EUP exist on v6e/v7x; v5e (and unknown chips) must stay f32."""
    try:
        kind = jax.devices()[0].device_kind.lower()
    except Exception:
        return jnp.float32
    if any(tag in kind for tag in ("v6", "v7", "tpu7")):
        return jnp.bfloat16
    return jnp.float32


# ----------------------------- fused model kernel ----------------------------
def _make_fused_lstm_kernel(num_layers, T, H, act_dtype):
    """Kernel closure. Ref order:
       x, (w_ih_t, w_hh_t, bias) * num_layers, fc_w_t, fc_b, out, gx0_scr, hbufs..."""

    def kernel(*refs):
        n_w = 3 * num_layers + 2
        x_ref = refs[0]
        w_refs = refs[1:1 + n_w]
        out_ref = refs[1 + n_w]
        gx0_scr = refs[2 + n_w]            # (B*T, 4H) f32, batch-major layer-0 gates_x
        hbufs = refs[3 + n_w:]             # 0/1/2 x (T*B, H) bf16 inter-layer sequences

        B = x_ref.shape[0]                 # batch block
        I = x_ref.shape[2]
        cdt = w_refs[0].dtype              # MXU operand dtype (bf16)

        h_last = None
        for layer in range(num_layers):
            wih = w_refs[3 * layer][...]        # (I_l, 4H) bf16
            whh = w_refs[3 * layer + 1][...]    # (H,   4H) bf16
            bias = w_refs[3 * layer + 2][...]   # (1,   4H) f32 (b_ih + b_hh)
            last_layer = layer == num_layers - 1

            # Hoisted input projection: ONE (rows, I_l) @ (I_l, 4H) MXU matmul per layer.
            if layer == 0:
                # (B, T, I) -> (B*T, I) collapses leading dims only (layout no-op,
                # batch-major row order b*T + t); no time-major staging stores.
                x2d = x_ref[...].reshape(B * T, I).astype(cdt)
                gx0_scr[...] = jnp.dot(x2d, wih,
                                       preferred_element_type=jnp.float32) + bias
                gx = None                        # read per step with a strided slice
            else:
                # hbuf is time-major (T*B, H) bf16 -> gx is time-major, contiguous reads.
                seq = hbufs[(layer - 1) % len(hbufs)][...]
                gx = jnp.dot(seq, wih, preferred_element_type=jnp.float32) + bias

            h = jnp.zeros((B, H), jnp.float32)
            c = jnp.zeros((B, H), jnp.float32)

            for t in range(T):                 # unrolled recurrence (serial dependence)
                if layer == 0:
                    # Batch-major rows {t, t+T, ...}: strided sublane load; off the
                    # serial h-chain so it overlaps with the recurrence.
                    gxt = gx0_scr[pl.ds(t, B, stride=T), :]
                else:
                    gxt = gx[t * B:(t + 1) * B, :]
                gates = gxt + jnp.dot(h.astype(cdt), whh,
                                      preferred_element_type=jnp.float32)
                # Full-vreg activations: 2 EUP passes per step (+ tanh(c)) instead of 4
                # sub-128-lane transcendentals. act_dtype is bf16 on v6e/v7x, f32 on v5e.
                ga = gates.astype(act_dtype)
                sig = jax.nn.sigmoid(ga)       # lanes [i | f | . | o] used
                th = jnp.tanh(ga)              # lanes [. | . | g | .] used
                i_g = sig[:, 0 * H:1 * H].astype(jnp.float32)
                f_g = sig[:, 1 * H:2 * H].astype(jnp.float32)
                g_g = th[:, 2 * H:3 * H].astype(jnp.float32)
                o_g = sig[:, 3 * H:4 * H].astype(jnp.float32)
                c = f_g * c + i_g * g_g                          # f32 state
                h = o_g * jnp.tanh(c.astype(act_dtype)).astype(jnp.float32)
                if not last_layer:
                    # hbuf ring: slot `layer % n_hbuf` is written here and consumed only
                    # by layer+1 before layer+2 overwrites it -> correct for any L.
                    # Stored in bf16: its only consumer is the next layer's MXU operand.
                    hbufs[layer % len(hbufs)][t * B:(t + 1) * B, :] = h.astype(cdt)
            h_last = h
            # inter-layer dropout: identity at inference.

        # ---- FC head on the final hidden state only (dropout = identity) ----
        wfc = w_refs[3 * num_layers][...]       # (H, O) bf16
        bfc = w_refs[3 * num_layers + 1][...]   # (1, O) f32
        out = jnp.dot(h_last.astype(cdt), wfc,
                      preferred_element_type=jnp.float32) + bfc
        # O=4 -> masked (B, 4) store; pad O to a multiple of 128 only if output_size scales.
        out_ref[...] = out.astype(out_ref.dtype)

    return kernel


def _fused_forward(params, x, *, batch_block=None):
    """x: (B, T, input_size) float32, batch_first (like the PyTorch module)."""
    B, T, I = x.shape
    layers = params["layers"]
    num_layers = len(layers)
    H = layers[0]["w_hh_t"].shape[0]
    O = params["fc_w_t"].shape[1]
    act_dtype = _activation_dtype()

    # Batch-parallel grid axis (megacore-ready on v7x: pass batch_block=B//2, ideally a
    # multiple of 8, once B is large). At B=2 this degenerates to grid=(1,).
    if batch_block is None or batch_block <= 0 or B % batch_block != 0:
        batch_block = B
    nb = B // batch_block

    inputs = [x]
    for lp in layers:
        inputs += [lp["w_ih_t"], lp["w_hh_t"], lp["bias"]]
    inputs += [params["fc_w_t"], params["fc_b"]]

    def full_spec(a):
        return pl.BlockSpec(a.shape, lambda i, _nd=a.ndim: (0,) * _nd)

    in_specs = [pl.BlockSpec((batch_block, T, I), lambda i: (i, 0, 0))]
    in_specs += [full_spec(a) for a in inputs[1:]]

    # VMEM scratch: layer-0 gates_x (f32, batch-major) + inter-layer hidden sequences
    # (bf16). Everything else (weights, gx of deeper layers, c/h state) lives in vregs.
    scratch = [pltpu.VMEM((batch_block * T, 4 * H), jnp.float32)]
    n_hbuf = min(2, max(0, num_layers - 1))
    scratch += [pltpu.VMEM((T * batch_block, H), jnp.bfloat16) for _ in range(n_hbuf)]

    kernel = _make_fused_lstm_kernel(num_layers, T, H, act_dtype)

    return pl.pallas_call(
        kernel,
        out_shape=jax.ShapeDtypeStruct((B, O), jnp.float32),
        grid_spec=pltpu.PrefetchScalarGridSpec(
            num_scalar_prefetch=0,
            grid=(nb,),
            in_specs=in_specs,
            out_specs=pl.BlockSpec((batch_block, O), lambda i: (i, 0)),
            scratch_shapes=scratch,
        ),
        compiler_params=pltpu.CompilerParams(
            dimension_semantics=("parallel",),
            # Explicit VMEM budget: the resident footprint here is <0.1 MiB; 32 MiB is
            # within scoped VMEM on v5e/v6e (128 MiB) and v7x (64 MiB physical). When
            # T*B grows, tile gx/hbufs along T instead of raising this further.
            vmem_limit_bytes=32 * 1024 * 1024,
        ),
    )(*inputs)


lstm_model_forward = jax.jit(_fused_forward, static_argnames=("batch_block",))


# ------------------------------- params / reference ---------------------------
def init_params(key, input_size, hidden_size, num_layers, output_size,
                compute_dtype=jnp.bfloat16):
    """nn.LSTM / nn.Linear shaped params (uniform +-1/sqrt(H)); matmul weights in bf16,
    biases combined and kept f32."""
    params = {"layers": []}
    bound = 1.0 / jnp.sqrt(jnp.float32(hidden_size))
    for layer in range(num_layers):
        in_sz = input_size if layer == 0 else hidden_size
        key, k1, k2, k3, k4 = jax.random.split(key, 5)
        w_ih = jax.random.uniform(k1, (4 * hidden_size, in_sz), jnp.float32, -bound, bound)
        w_hh = jax.random.uniform(k2, (4 * hidden_size, hidden_size), jnp.float32, -bound, bound)
        b_ih = jax.random.uniform(k3, (4 * hidden_size,), jnp.float32, -bound, bound)
        b_hh = jax.random.uniform(k4, (4 * hidden_size,), jnp.float32, -bound, bound)
        params["layers"].append(
            {
                "w_ih_t": w_ih.T.astype(compute_dtype),        # (I, 4H)
                "w_hh_t": w_hh.T.astype(compute_dtype),        # (H, 4H)
                "bias": (b_ih + b_hh).reshape(1, -1),          # (1, 4H) f32
            }
        )
    key, k5, k6 = jax.random.split(key, 3)
    w_fc = jax.random.uniform(k5, (output_size, hidden_size), jnp.float32, -bound, bound)
    b_fc = jax.random.uniform(k6, (output_size,), jnp.float32, -bound, bound)
    params["fc_w_t"] = w_fc.T.astype(compute_dtype)            # (H, O)
    params["fc_b"] = b_fc.reshape(1, -1)                       # (1, O) f32
    return params


def _reference_forward(params, x, act_dtype=jnp.float32):
    """Pure-JAX reference mirroring the kernel's numerics (bf16 matmul operands, f32
    accumulation, act_dtype activations) so the check is apples-to-apples."""
    B, T, _ = x.shape
    seq = x
    for lp in params["layers"]:
        wih = lp["w_ih_t"].astype(jnp.float32)
        whh = lp["w_hh_t"].astype(jnp.float32)
        b = lp["bias"]
        H = whh.shape[0]
        h = jnp.zeros((B, H), jnp.float32)
        c = jnp.zeros((B, H), jnp.float32)
        outs = []
        for t in range(T):
            x_t = seq[:, t, :].astype(jnp.bfloat16).astype(jnp.float32)
            h_b = h.astype(jnp.bfloat16).astype(jnp.float32)
            g = (x_t @ wih + h_b @ whh + b).astype(act_dtype)
            i_g = jax.nn.sigmoid(g[:, :H]).astype(jnp.float32)
            f_g = jax.nn.sigmoid(g[:, H:2 * H]).astype(jnp.float32)
            g_g = jnp.tanh(g[:, 2 * H:3 * H]).astype(jnp.float32)
            o_g = jax.nn.sigmoid(g[:, 3 * H:]).astype(jnp.float32)
            c = f_g * c + i_g * g_g
            h = o_g * jnp.tanh(c.astype(act_dtype)).astype(jnp.float32)
            outs.append(h)
        seq = jnp.stack(outs, axis=1)
    h_b = seq[:, -1, :].astype(jnp.bfloat16).astype(jnp.float32)
    return h_b @ params["fc_w_t"].astype(jnp.float32) + params["fc_b"]


if __name__ == "__main__":
    INPUT_SIZE = 16
    HIDDEN_SIZE = 32
    NUM_LAYERS = 2
    OUTPUT_SIZE = 4
    BATCH = 2
    SEQ = 8

    key = jax.random.PRNGKey(0)
    key, pkey, xkey = jax.random.split(key, 3)
    params = init_params(pkey, INPUT_SIZE, HIDDEN_SIZE, NUM_LAYERS, OUTPUT_SIZE)
    x = jax.random.normal(xkey, (BATCH, SEQ, INPUT_SIZE), jnp.float32)

    out = lstm_model_forward(params, x)
    jax.block_until_ready(out)
    assert out.shape == (BATCH, OUTPUT_SIZE), out.shape

    ref = _reference_forward(params, x, act_dtype=_activation_dtype())
    assert bool(jnp.allclose(out, ref, atol=5e-2, rtol=5e-2)), (out, ref)

    print("KERNEL_OK")
</pallas_src>

<mosaic_0001>
module attributes {stable_mosaic.version = 11 : i64} {
  func.func @kernel(%arg0: i32, %arg1: memref<2x8x16xf32, #tpu.memory_space<vmem>>, %arg2: memref<16x128xbf16, #tpu.memory_space<vmem>>, %arg3: memref<32x128xbf16, #tpu.memory_space<vmem>>, %arg4: memref<1x128xf32, #tpu.memory_space<vmem>>, %arg5: memref<32x128xbf16, #tpu.memory_space<vmem>>, %arg6: memref<32x128xbf16, #tpu.memory_space<vmem>>, %arg7: memref<1x128xf32, #tpu.memory_space<vmem>>, %arg8: memref<32x4xbf16, #tpu.memory_space<vmem>>, %arg9: memref<1x4xf32, #tpu.memory_space<vmem>>, %arg10: memref<2x4xf32, #tpu.memory_space<vmem>>, %arg11: memref<16x128xf32, #tpu.memory_space<vmem>>, %arg12: memref<16x32xbf16, #tpu.memory_space<vmem>>) attributes {dimension_semantics = [#tpu.dimension_semantics<parallel>], iteration_bounds = array<i64: 1>, scalar_prefetch = 0 : i64, scratch_operands = 2 : i64, tpu.core_type = #tpu.core_type<tc>, window_params = [{transform_indices = @transform_0, window_bounds = array<i64: 2, 8, 16>}, {pipeline_mode = #tpu.pipeline_mode<synchronous>, transform_indices = @transform_1, window_bounds = array<i64: 16, 128>}, {pipeline_mode = #tpu.pipeline_mode<synchronous>, transform_indices = @transform_2, window_bounds = array<i64: 32, 128>}, {pipeline_mode = #tpu.pipeline_mode<synchronous>, transform_indices = @transform_3, window_bounds = array<i64: 1, 128>}, {pipeline_mode = #tpu.pipeline_mode<synchronous>, transform_indices = @transform_4, window_bounds = array<i64: 32, 128>}, {pipeline_mode = #tpu.pipeline_mode<synchronous>, transform_indices = @transform_5, window_bounds = array<i64: 32, 128>}, {pipeline_mode = #tpu.pipeline_mode<synchronous>, transform_indices = @transform_6, window_bounds = array<i64: 1, 128>}, {pipeline_mode = #tpu.pipeline_mode<synchronous>, transform_indices = @transform_7, window_bounds = array<i64: 32, 4>}, {pipeline_mode = #tpu.pipeline_mode<synchronous>, transform_indices = @transform_8, window_bounds = array<i64: 1, 4>}, {transform_indices = @transform_9, window_bounds = array<i64: 2, 4>}]} {
    %c0 = arith.constant 0 : index
    %c0_0 = arith.constant 0 : index
    %0 = vector.load %arg2[%c0, %c0_0] : memref<16x128xbf16, #tpu.memory_space<vmem>>, vector<16x128xbf16>
    %c0_1 = arith.constant 0 : index
    %c0_2 = arith.constant 0 : index
    %1 = vector.load %arg3[%c0_1, %c0_2] : memref<32x128xbf16, #tpu.memory_space<vmem>>, vector<32x128xbf16>
    %c0_3 = arith.constant 0 : index
    %c0_4 = arith.constant 0 : index
    %2 = vector.load %arg4[%c0_3, %c0_4] : memref<1x128xf32, #tpu.memory_space<vmem>>, vector<1x128xf32>
    %c0_5 = arith.constant 0 : index
    %c0_6 = arith.constant 0 : index
    %c0_7 = arith.constant 0 : index
    %3 = vector.load %arg1[%c0_5, %c0_6, %c0_7] : memref<2x8x16xf32, #tpu.memory_space<vmem>>, vector<2x8x16xf32>
    %4 = vector.shape_cast %3 : vector<2x8x16xf32> to vector<16x16xf32>
    %5 = arith.truncf %4 : vector<16x16xf32> to vector<16x16xbf16>
    %cst = arith.constant dense<0.000000e+00> : vector<16x128xf32>
    %6 = tpu.matmul %5, %0, %cst {dimension_numbers = #tpu.dot_dimension_numbers<[1], [0], [0], [1], [0, 0, 1, 1], [], []>} : vector<16x16xbf16>, vector<16x128xbf16>, vector<16x128xf32> -> vector<16x128xf32>
    %7 = vector.broadcast %2 : vector<1x128xf32> to vector<16x128xf32>
    %8 = arith.addf %6, %7 : vector<16x128xf32>
    %c0_8 = arith.constant 0 : index
    %c0_9 = arith.constant 0 : index
    %9 = vector.load %arg11[%c0_8, %c0_9] : memref<16x128xf32, #tpu.memory_space<vmem>>, vector<16x128xf32>
    tpu.vector_store %arg11[%c0_8, %c0_9], %8 {strides = array<i32>} : memref<16x128xf32, #tpu.memory_space<vmem>>, vector<16x128xf32>,
    %cst_10 = arith.constant 0.000000e+00 : f32
    %10 = vector.broadcast %cst_10 : f32 to vector<2x32xf32>
    %cst_11 = arith.constant 0.000000e+00 : f32
    %11 = vector.broadcast %cst_11 : f32 to vector<2x32xf32>
    %c0_12 = arith.constant 0 : index
    %c0_13 = arith.constant 0 : index
    %12 = tpu.strided_load %arg11[%c0_12, %c0_13] {strides = array<i32: 8, 1>} : memref<16x128xf32, #tpu.memory_space<vmem>>, vector<2x128xf32>
    %13 = arith.truncf %10 : vector<2x32xf32> to vector<2x32xbf16>
    %cst_14 = arith.constant dense<0.000000e+00> : vector<2x128xf32>
    %14 = tpu.matmul %13, %1, %cst_14 {dimension_numbers = #tpu.dot_dimension_numbers<[1], [0], [0], [1], [0, 0, 1, 1], [], []>} : vector<2x32xbf16>, vector<32x128xbf16>, vector<2x128xf32> -> vector<2x128xf32>
    %15 = arith.addf %12, %14 : vector<2x128xf32>
    %16 = arith.negf %15 : vector<2x128xf32>
    %17 = math.exp %16 : vector<2x128xf32>
    %cst_15 = arith.constant 1.000000e+00 : f32
    %18 = vector.broadcast %cst_15 : f32 to vector<2x128xf32>
    %19 = arith.addf %18, %17 : vector<2x128xf32>
    %20 = arith.divf %18, %19 : vector<2x128xf32>
    %21 = math.tanh %15 : vector<2x128xf32>
    %22 = vector.extract_strided_slice %20 {offsets = [0, 0], sizes = [2, 32], strides = [1, 1]} : vector<2x128xf32> to vector<2x32xf32>
    %23 = vector.extract_strided_slice %20 {offsets = [0, 32], sizes = [2, 32], strides = [1, 1]} : vector<2x128xf32> to vector<2x32xf32>
    %24 = vector.extract_strided_slice %21 {offsets = [0, 64], sizes = [2, 32], strides = [1, 1]} : vector<2x128xf32> to vector<2x32xf32>
    %25 = vector.extract_strided_slice %20 {offsets = [0, 96], sizes = [2, 32], strides = [1, 1]} : vector<2x128xf32> to vector<2x32xf32>
    %26 = arith.mulf %23, %11 : vector<2x32xf32>
    %27 = arith.mulf %22, %24 : vector<2x32xf32>
    %28 = arith.addf %26, %27 : vector<2x32xf32>
    %29 = math.tanh %28 : vector<2x32xf32>
    %30 = arith.mulf %25, %29 : vector<2x32xf32>
    %31 = arith.truncf %30 : vector<2x32xf32> to vector<2x32xbf16>
    %c0_16 = arith.constant 0 : index
    %c0_17 = arith.constant 0 : index
    %32 = vector.load %arg12[%c0_16, %c0_17] : memref<16x32xbf16, #tpu.memory_space<vmem>>, vector<2x32xbf16>
    tpu.vector_store %arg12[%c0_16, %c0_17], %31 {strides = array<i32>} : memref<16x32xbf16, #tpu.memory_space<vmem>>, vector<2x32xbf16>,
    %c1 = arith.constant 1 : index
    %c0_18 = arith.constant 0 : index
    %33 = tpu.strided_load %arg11[%c1, %c0_18] {strides = array<i32: 8, 1>} : memref<16x128xf32, #tpu.memory_space<vmem>>, vector<2x128xf32>
    %34 = arith.truncf %30 : vector<2x32xf32> to vector<2x32xbf16>
    %cst_19 = arith.constant dense<0.000000e+00> : vector<2x128xf32>
    %35 = tpu.matmul %34, %1, %cst_19 {dimension_numbers = #tpu.dot_dimension_numbers<[1], [0], [0], [1], [0, 0, 1, 1], [], []>} : vector<2x32xbf16>, vector<32x128xbf16>, vector<2x128xf32> -> vector<2x128xf32>
    %36 = arith.addf %33, %35 : vector<2x128xf32>
    %37 = arith.negf %36 : vector<2x128xf32>
    %38 = math.exp %37 : vector<2x128xf32>
    %cst_20 = arith.constant 1.000000e+00 : f32
    %39 = vector.broadcast %cst_20 : f32 to vector<2x128xf32>
    %40 = arith.addf %39, %38 : vector<2x128xf32>
    %41 = arith.divf %39, %40 : vector<2x128xf32>
    %42 = math.tanh %36 : vector<2x128xf32>
    %43 = vector.extract_strided_slice %41 {offsets = [0, 0], sizes = [2, 32], strides = [1, 1]} : vector<2x128xf32> to vector<2x32xf32>
    %44 = vector.extract_strided_slice %41 {offsets = [0, 32], sizes = [2, 32], strides = [1, 1]} : vector<2x128xf32> to vector<2x32xf32>
    %45 = vector.extract_strided_slice %42 {offsets = [0, 64], sizes = [2, 32], strides = [1, 1]} : vector<2x128xf32> to vector<2x32xf32>
    %46 = vector.extract_strided_slice %41 {offsets = [0, 96], sizes = [2, 32], strides = [1, 1]} : vector<2x128xf32> to vector<2x32xf32>
    %47 = arith.mulf %44, %28 : vector<2x32xf32>
    %48 = arith.mulf %43, %45 : vector<2x32xf32>
    %49 = arith.addf %47, %48 : vector<2x32xf32>
    %50 = math.tanh %49 : vector<2x32xf32>
    %51 = arith.mulf %46, %50 : vector<2x32xf32>
    %52 = arith.truncf %51 : vector<2x32xf32> to vector<2x32xbf16>
    %c2 = arith.constant 2 : index
    %c0_21 = arith.constant 0 : index
    %53 = vector.load %arg12[%c2, %c0_21] : memref<16x32xbf16, #tpu.memory_space<vmem>>, vector<2x32xbf16>
    tpu.vector_store %arg12[%c2, %c0_21], %52 {strides = array<i32>} : memref<16x32xbf16, #tpu.memory_space<vmem>>, vector<2x32xbf16>,
    %c2_22 = arith.constant 2 : index
    %c0_23 = arith.constant 0 : index
    %54 = tpu.strided_load %arg11[%c2_22, %c0_23] {strides = array<i32: 8, 1>} : memref<16x128xf32, #tpu.memory_space<vmem>>, vector<2x128xf32>
    %55 = arith.truncf %51 : vector<2x32xf32> to vector<2x32xbf16>
    %cst_24 = arith.constant dense<0.000000e+00> : vector<2x128xf32>
    %56 = tpu.matmul %55, %1, %cst_24 {dimension_numbers = #tpu.dot_dimension_numbers<[1], [0], [0], [1], [0, 0, 1, 1], [], []>} : vector<2x32xbf16>, vector<32x128xbf16>, vector<2x128xf32> -> vector<2x128xf32>
    %57 = arith.addf %54, %56 : vector<2x128xf32>
    %58 = arith.negf %57 : vector<2x128xf32>
    %59 = math.exp %58 : vector<2x128xf32>
    %cst_25 = arith.constant 1.000000e+00 : f32
    %60 = vector.broadcast %cst_25 : f32 to vector<2x128xf32>
    %61 = arith.addf %60, %59 : vector<2x128xf32>
    %62 = arith.divf %60, %61 : vector<2x128xf32>
    %63 = math.tanh %57 : vector<2x128xf32>
    %64 = vector.extract_strided_slice %62 {offsets = [0, 0], sizes = [2, 32], strides = [1, 1]} : vector<2x128xf32> to vector<2x32xf32>
    %65 = vector.extract_strided_slice %62 {offsets = [0, 32], sizes = [2, 32], strides = [1, 1]} : vector<2x128xf32> to vector<2x32xf32>
    %66 = vector.extract_strided_slice %63 {offsets = [0, 64], sizes = [2, 32], strides = [1, 1]} : vector<2x128xf32> to vector<2x32xf32>
    %67 = vector.extract_strided_slice %62 {offsets = [0, 96], sizes = [2, 32], strides = [1, 1]} : vector<2x128xf32> to vector<2x32xf32>
    %68 = arith.mulf %65, %49 : vector<2x32xf32>
    %69 = arith.mulf %64, %66 : vector<2x32xf32>
    %70 = arith.addf %68, %69 : vector<2x32xf32>
    %71 = math.tanh %70 : vector<2x32xf32>
    %72 = arith.mulf %67, %71 : vector<2x32xf32>
    %73 = arith.truncf %72 : vector<2x32xf32> to vector<2x32xbf16>
    %c4 = arith.constant 4 : index
    %c0_26 = arith.constant 0 : index
    %74 = vector.load %arg12[%c4, %c0_26] : memref<16x32xbf16, #tpu.memory_space<vmem>>, vector<2x32xbf16>
    tpu.vector_store %arg12[%c4, %c0_26], %73 {strides = array<i32>} : memref<16x32xbf16, #tpu.memory_space<vmem>>, vector<2x32xbf16>,
    %c3 = arith.constant 3 : index
    %c0_27 = arith.constant 0 : index
    %75 = tpu.strided_load %arg11[%c3, %c0_27] {strides = array<i32: 8, 1>} : memref<16x128xf32, #tpu.memory_space<vmem>>, vector<2x128xf32>
    %76 = arith.truncf %72 : vector<2x32xf32> to vector<2x32xbf16>
    %cst_28 = arith.constant dense<0.000000e+00> : vector<2x128xf32>
    %77 = tpu.matmul %76, %1, %cst_28 {dimension_numbers = #tpu.dot_dimension_numbers<[1], [0], [0], [1], [0, 0, 1, 1], [], []>} : vector<2x32xbf16>, vector<32x128xbf16>, vector<2x128xf32> -> vector<2x128xf32>
    %78 = arith.addf %75, %77 : vector<2x128xf32>
    %79 = arith.negf %78 : vector<2x128xf32>
    %80 = math.exp %79 : vector<2x128xf32>
    %cst_29 = arith.constant 1.000000e+00 : f32
    %81 = vector.broadcast %cst_29 : f32 to vector<2x128xf32>
    %82 = arith.addf %81, %80 : vector<2x128xf32>
    %83 = arith.divf %81, %82 : vector<2x128xf32>
    %84 = math.tanh %78 : vector<2x128xf32>
    %85 = vector.extract_strided_slice %83 {offsets = [0, 0], sizes = [2, 32], strides = [1, 1]} : vector<2x128xf32> to vector<2x32xf32>
    %86 = vector.extract_strided_slice %83 {offsets = [0, 32], sizes = [2, 32], strides = [1, 1]} : vector<2x128xf32> to vector<2x32xf32>
    %87 = vector.extract_strided_slice %84 {offsets = [0, 64], sizes = [2, 32], strides = [1, 1]} : vector<2x128xf32> to vector<2x32xf32>
    %88 = vector.extract_strided_slice %83 {offsets = [0, 96], sizes = [2, 32], strides = [1, 1]} : vector<2x128xf32> to vector<2x32xf32>
    %89 = arith.mulf %86, %70 : vector<2x32xf32>
    %90 = arith.mulf %85, %87 : vector<2x32xf32>
    %91 = arith.addf %89, %90 : vector<2x32xf32>
    %92 = math.tanh %91 : vector<2x32xf32>
    %93 = arith.mulf %88, %92 : vector<2x32xf32>
    %94 = arith.truncf %93 : vector<2x32xf32> to vector<2x32xbf16>
    %c6 = arith.constant 6 : index
    %c0_30 = arith.constant 0 : index
    %95 = vector.load %arg12[%c6, %c0_30] : memref<16x32xbf16, #tpu.memory_space<vmem>>, vector<2x32xbf16>
    tpu.vector_store %arg12[%c6, %c0_30], %94 {strides = array<i32>} : memref<16x32xbf16, #tpu.memory_space<vmem>>, vector<2x32xbf16>,
    %c4_31 = arith.constant 4 : index
    %c0_32 = arith.constant 0 : index
    %96 = tpu.strided_load %arg11[%c4_31, %c0_32] {strides = array<i32: 8, 1>} : memref<16x128xf32, #tpu.memory_space<vmem>>, vector<2x128xf32>
    %97 = arith.truncf %93 : vector<2x32xf32> to vector<2x32xbf16>
    %cst_33 = arith.constant dense<0.000000e+00> : vector<2x128xf32>
    %98 = tpu.matmul %97, %1, %cst_33 {dimension_numbers = #tpu.dot_dimension_numbers<[1], [0], [0], [1], [0, 0, 1, 1], [], []>} : vector<2x32xbf16>, vector<32x128xbf16>, vector<2x128xf32> -> vector<2x128xf32>
    %99 = arith.addf %96, %98 : vector<2x128xf32>
    %100 = arith.negf %99 : vector<2x128xf32>
    %101 = math.exp %100 : vector<2x128xf32>
    %cst_34 = arith.constant 1.000000e+00 : f32
    %102 = vector.broadcast %cst_34 : f32 to vector<2x128xf32>
    %103 = arith.addf %102, %101 : vector<2x128xf32>
    %104 = arith.divf %102, %103 : vector<2x128xf32>
    %105 = math.tanh %99 : vector<2x128xf32>
    %106 = vector.extract_strided_slice %104 {offsets = [0, 0], sizes = [2, 32], strides = [1, 1]} : vector<2x128xf32> to vector<2x32xf32>
    %107 = vector.extract_strided_slice %104 {offsets = [0, 32], sizes = [2, 32], strides = [1, 1]} : vector<2x128xf32> to vector<2x32xf32>
    %108 = vector.extract_strided_slice %105 {offsets = [0, 64], sizes = [2, 32], strides = [1, 1]} : vector<2x128xf32> to vector<2x32xf32>
    %109 = vector.extract_strided_slice %104 {offsets = [0, 96], sizes = [2, 32], strides = [1, 1]} : vector<2x128xf32> to vector<2x32xf32>
    %110 = arith.mulf %107, %91 : vector<2x32xf32>
    %111 = arith.mulf %106, %108 : vector<2x32xf32>
    %112 = arith.addf %110, %111 : vector<2x32xf32>
    %113 = math.tanh %112 : vector<2x32xf32>
    %114 = arith.mulf %109, %113 : vector<2x32xf32>
    %115 = arith.truncf %114 : vector<2x32xf32> to vector<2x32xbf16>
    %c8 = arith.constant 8 : index
    %c0_35 = arith.constant 0 : index
    %116 = vector.load %arg12[%c8, %c0_35] : memref<16x32xbf16, #tpu.memory_space<vmem>>, vector<2x32xbf16>
    tpu.vector_store %arg12[%c8, %c0_35], %115 {strides = array<i32>} : memref<16x32xbf16, #tpu.memory_space<vmem>>, vector<2x32xbf16>,
    %c5 = arith.constant 5 : index
    %c0_36 = arith.constant 0 : index
    %117 = tpu.strided_load %arg11[%c5, %c0_36] {strides = array<i32: 8, 1>} : memref<16x128xf32, #tpu.memory_space<vmem>>, vector<2x128xf32>
    %118 = arith.truncf %114 : vector<2x32xf32> to vector<2x32xbf16>
    %cst_37 = arith.constant dense<0.000000e+00> : vector<2x128xf32>
    %119 = tpu.matmul %118, %1, %cst_37 {dimension_numbers = #tpu.dot_dimension_numbers<[1], [0], [0], [1], [0, 0, 1, 1], [], []>} : vector<2x32xbf16>, vector<32x128xbf16>, vector<2x128xf32> -> vector<2x128xf32>
    %120 = arith.addf %117, %119 : vector<2x128xf32>
    %121 = arith.negf %120 : vector<2x128xf32>
    %122 = math.exp %121 : vector<2x128xf32>
    %cst_38 = arith.constant 1.000000e+00 : f32
    %123 = vector.broadcast %cst_38 : f32 to vector<2x128xf32>
    %124 = arith.addf %123, %122 : vector<2x128xf32>
    %125 = arith.divf %123, %124 : vector<2x128xf32>
    %126 = math.tanh %120 : vector<2x128xf32>
    %127 = vector.extract_strided_slice %125 {offsets = [0, 0], sizes = [2, 32], strides = [1, 1]} : vector<2x128xf32> to vector<2x32xf32>
    %128 = vector.extract_strided_slice %125 {offsets = [0, 32], sizes = [2, 32], strides = [1, 1]} : vector<2x128xf32> to vector<2x32xf32>
    %129 = vector.extract_strided_slice %126 {offsets = [0, 64], sizes = [2, 32], strides = [1, 1]} : vector<2x128xf32> to vector<2x32xf32>
    %130 = vector.extract_strided_slice %125 {offsets = [0, 96], sizes = [2, 32], strides = [1, 1]} : vector<2x128xf32> to vector<2x32xf32>
    %131 = arith.mulf %128, %112 : vector<2x32xf32>
    %132 = arith.mulf %127, %129 : vector<2x32xf32>
    %133 = arith.addf %131, %132 : vector<2x32xf32>
    %134 = math.tanh %133 : vector<2x32xf32>
    %135 = arith.mulf %130, %134 : vector<2x32xf32>
    %136 = arith.truncf %135 : vector<2x32xf32> to vector<2x32xbf16>
    %c10 = arith.constant 10 : index
    %c0_39 = arith.constant 0 : index
    %137 = vector.load %arg12[%c10, %c0_39] : memref<16x32xbf16, #tpu.memory_space<vmem>>, vector<2x32xbf16>
    tpu.vector_store %arg12[%c10, %c0_39], %136 {strides = array<i32>} : memref<16x32xbf16, #tpu.memory_space<vmem>>, vector<2x32xbf16>,
    %c6_40 = arith.constant 6 : index
    %c0_41 = arith.constant 0 : index
    %138 = tpu.strided_load %arg11[%c6_40, %c0_41] {strides = array<i32: 8, 1>} : memref<16x128xf32, #tpu.memory_space<vmem>>, vector<2x128xf32>
    %139 = arith.truncf %135 : vector<2x32xf32> to vector<2x32xbf16>
    %cst_42 = arith.constant dense<0.000000e+00> : vector<2x128xf32>
    %140 = tpu.matmul %139, %1, %cst_42 {dimension_numbers = #tpu.dot_dimension_numbers<[1], [0], [0], [1], [0, 0, 1, 1], [], []>} : vector<2x32xbf16>, vector<32x128xbf16>, vector<2x128xf32> -> vector<2x128xf32>
    %141 = arith.addf %138, %140 : vector<2x128xf32>
    %142 = arith.negf %141 : vector<2x128xf32>
    %143 = math.exp %142 : vector<2x128xf32>
    %cst_43 = arith.constant 1.000000e+00 : f32
    %144 = vector.broadcast %cst_43 : f32 to vector<2x128xf32>
    %145 = arith.addf %144, %143 : vector<2x128xf32>
    %146 = arith.divf %144, %145 : vector<2x128xf32>
    %147 = math.tanh %141 : vector<2x128xf32>
    %148 = vector.extract_strided_slice %146 {offsets = [0, 0], sizes = [2, 32], strides = [1, 1]} : vector<2x128xf32> to vector<2x32xf32>
    %149 = vector.extract_strided_slice %146 {offsets = [0, 32], sizes = [2, 32], strides = [1, 1]} : vector<2x128xf32> to vector<2x32xf32>
    %150 = vector.extract_strided_slice %147 {offsets = [0, 64], sizes = [2, 32], strides = [1, 1]} : vector<2x128xf32> to vector<2x32xf32>
    %151 = vector.extract_strided_slice %146 {offsets = [0, 96], sizes = [2, 32], strides = [1, 1]} : vector<2x128xf32> to vector<2x32xf32>
    %152 = arith.mulf %149, %133 : vector<2x32xf32>
    %153 = arith.mulf %148, %150 : vector<2x32xf32>
    %154 = arith.addf %152, %153 : vector<2x32xf32>
    %155 = math.tanh %154 : vector<2x32xf32>
    %156 = arith.mulf %151, %155 : vector<2x32xf32>
    %157 = arith.truncf %156 : vector<2x32xf32> to vector<2x32xbf16>
    %c12 = arith.constant 12 : index
    %c0_44 = arith.constant 0 : index
    %158 = vector.load %arg12[%c12, %c0_44] : memref<16x32xbf16, #tpu.memory_space<vmem>>, vector<2x32xbf16>
    tpu.vector_store %arg12[%c12, %c0_44], %157 {strides = array<i32>} : memref<16x32xbf16, #tpu.memory_space<vmem>>, vector<2x32xbf16>,
    %c7 = arith.constant 7 : index
    %c0_45 = arith.constant 0 : index
    %159 = tpu.strided_load %arg11[%c7, %c0_45] {strides = array<i32: 8, 1>} : memref<16x128xf32, #tpu.memory_space<vmem>>, vector<2x128xf32>
    %160 = arith.truncf %156 : vector<2x32xf32> to vector<2x32xbf16>
    %cst_46 = arith.constant dense<0.000000e+00> : vector<2x128xf32>
    %161 = tpu.matmul %160, %1, %cst_46 {dimension_numbers = #tpu.dot_dimension_numbers<[1], [0], [0], [1], [0, 0, 1, 1], [], []>} : vector<2x32xbf16>, vector<32x128xbf16>, vector<2x128xf32> -> vector<2x128xf32>
    %162 = arith.addf %159, %161 : vector<2x128xf32>
    %163 = arith.negf %162 : vector<2x128xf32>
    %164 = math.exp %163 : vector<2x128xf32>
    %cst_47 = arith.constant 1.000000e+00 : f32
    %165 = vector.broadcast %cst_47 : f32 to vector<2x128xf32>
    %166 = arith.addf %165, %164 : vector<2x128xf32>
    %167 = arith.divf %165, %166 : vector<2x128xf32>
    %168 = math.tanh %162 : vector<2x128xf32>
    %169 = vector.extract_strided_slice %167 {offsets = [0, 0], sizes = [2, 32], strides = [1, 1]} : vector<2x128xf32> to vector<2x32xf32>
    %170 = vector.extract_strided_slice %167 {offsets = [0, 32], sizes = [2, 32], strides = [1, 1]} : vector<2x128xf32> to vector<2x32xf32>
    %171 = vector.extract_strided_slice %168 {offsets = [0, 64], sizes = [2, 32], strides = [1, 1]} : vector<2x128xf32> to vector<2x32xf32>
    %172 = vector.extract_strided_slice %167 {offsets = [0, 96], sizes = [2, 32], strides = [1, 1]} : vector<2x128xf32> to vector<2x32xf32>
    %173 = arith.mulf %170, %154 : vector<2x32xf32>
    %174 = arith.mulf %169, %171 : vector<2x32xf32>
    %175 = arith.addf %173, %174 : vector<2x32xf32>
    %176 = math.tanh %175 : vector<2x32xf32>
    %177 = arith.mulf %172, %176 : vector<2x32xf32>
    %178 = arith.truncf %177 : vector<2x32xf32> to vector<2x32xbf16>
    %c14 = arith.constant 14 : index
    %c0_48 = arith.constant 0 : index
    %179 = vector.load %arg12[%c14, %c0_48] : memref<16x32xbf16, #tpu.memory_space<vmem>>, vector<2x32xbf16>
    tpu.vector_store %arg12[%c14, %c0_48], %178 {strides = array<i32>} : memref<16x32xbf16, #tpu.memory_space<vmem>>, vector<2x32xbf16>,
    %c0_49 = arith.constant 0 : index
    %c0_50 = arith.constant 0 : index
    %180 = vector.load %arg5[%c0_49, %c0_50] : memref<32x128xbf16, #tpu.memory_space<vmem>>, vector<32x128xbf16>
    %c0_51 = arith.constant 0 : index
    %c0_52 = arith.constant 0 : index
    %181 = vector.load %arg6[%c0_51, %c0_52] : memref<32x128xbf16, #tpu.memory_space<vmem>>, vector<32x128xbf16>
    %c0_53 = arith.constant 0 : index
    %c0_54 = arith.constant 0 : index
    %182 = vector.load %arg7[%c0_53, %c0_54] : memref<1x128xf32, #tpu.memory_space<vmem>>, vector<1x128xf32>
    %c0_55 = arith.constant 0 : index
    %c0_56 = arith.constant 0 : index
    %183 = vector.load %arg12[%c0_55, %c0_56] : memref<16x32xbf16, #tpu.memory_space<vmem>>, vector<16x32xbf16>
    %cst_57 = arith.constant dense<0.000000e+00> : vector<16x128xf32>
    %184 = tpu.matmul %183, %180, %cst_57 {dimension_numbers = #tpu.dot_dimension_numbers<[1], [0], [0], [1], [0, 0, 1, 1], [], []>} : vector<16x32xbf16>, vector<32x128xbf16>, vector<16x128xf32> -> vector<16x128xf32>
    %185 = vector.broadcast %182 : vector<1x128xf32> to vector<16x128xf32>
    %186 = arith.addf %184, %185 : vector<16x128xf32>
    %cst_58 = arith.constant 0.000000e+00 : f32
    %187 = vector.broadcast %cst_58 : f32 to vector<2x32xf32>
    %cst_59 = arith.constant 0.000000e+00 : f32
    %188 = vector.broadcast %cst_59 : f32 to vector<2x32xf32>
    %189 = vector.extract_strided_slice %186 {offsets = [0, 0], sizes = [2, 128], strides = [1, 1]} : vector<16x128xf32> to vector<2x128xf32>
    %190 = arith.truncf %187 : vector<2x32xf32> to vector<2x32xbf16>
    %cst_60 = arith.constant dense<0.000000e+00> : vector<2x128xf32>
    %191 = tpu.matmul %190, %181, %cst_60 {dimension_numbers = #tpu.dot_dimension_numbers<[1], [0], [0], [1], [0, 0, 1, 1], [], []>} : vector<2x32xbf16>, vector<32x128xbf16>, vector<2x128xf32> -> vector<2x128xf32>
    %192 = arith.addf %189, %191 : vector<2x128xf32>
    %193 = arith.negf %192 : vector<2x128xf32>
    %194 = math.exp %193 : vector<2x128xf32>
    %cst_61 = arith.constant 1.000000e+00 : f32
    %195 = vector.broadcast %cst_61 : f32 to vector<2x128xf32>
    %196 = arith.addf %195, %194 : vector<2x128xf32>
    %197 = arith.divf %195, %196 : vector<2x128xf32>
    %198 = math.tanh %192 : vector<2x128xf32>
    %199 = vector.extract_strided_slice %197 {offsets = [0, 0], sizes = [2, 32], strides = [1, 1]} : vector<2x128xf32> to vector<2x32xf32>
    %200 = vector.extract_strided_slice %197 {offsets = [0, 32], sizes = [2, 32], strides = [1, 1]} : vector<2x128xf32> to vector<2x32xf32>
    %201 = vector.extract_strided_slice %198 {offsets = [0, 64], sizes = [2, 32], strides = [1, 1]} : vector<2x128xf32> to vector<2x32xf32>
    %202 = vector.extract_strided_slice %197 {offsets = [0, 96], sizes = [2, 32], strides = [1, 1]} : vector<2x128xf32> to vector<2x32xf32>
    %203 = arith.mulf %200, %188 : vector<2x32xf32>
    %204 = arith.mulf %199, %201 : vector<2x32xf32>
    %205 = arith.addf %203, %204 : vector<2x32xf32>
    %206 = math.tanh %205 : vector<2x32xf32>
    %207 = arith.mulf %202, %206 : vector<2x32xf32>
    %208 = vector.extract_strided_slice %186 {offsets = [2, 0], sizes = [2, 128], strides = [1, 1]} : vector<16x128xf32> to vector<2x128xf32>
    %209 = arith.truncf %207 : vector<2x32xf32> to vector<2x32xbf16>
    %cst_62 = arith.constant dense<0.000000e+00> : vector<2x128xf32>
    %210 = tpu.matmul %209, %181, %cst_62 {dimension_numbers = #tpu.dot_dimension_numbers<[1], [0], [0], [1], [0, 0, 1, 1], [], []>} : vector<2x32xbf16>, vector<32x128xbf16>, vector<2x128xf32> -> vector<2x128xf32>
    %211 = arith.addf %208, %210 : vector<2x128xf32>
    %212 = arith.negf %211 : vector<2x128xf32>
    %213 = math.exp %212 : vector<2x128xf32>
    %cst_63 = arith.constant 1.000000e+00 : f32
    %214 = vector.broadcast %cst_63 : f32 to vector<2x128xf32>
    %215 = arith.addf %214, %213 : vector<2x128xf32>
    %216 = arith.divf %214, %215 : vector<2x128xf32>
    %217 = math.tanh %211 : vector<2x128xf32>
    %218 = vector.extract_strided_slice %216 {offsets = [0, 0], sizes = [2, 32], strides = [1, 1]} : vector<2x128xf32> to vector<2x32xf32>
    %219 = vector.extract_strided_slice %216 {offsets = [0, 32], sizes = [2, 32], strides = [1, 1]} : vector<2x128xf32> to vector<2x32xf32>
    %220 = vector.extract_strided_slice %217 {offsets = [0, 64], sizes = [2, 32], strides = [1, 1]} : vector<2x128xf32> to vector<2x32xf32>
    %221 = vector.extract_strided_slice %216 {offsets = [0, 96], sizes = [2, 32], strides = [1, 1]} : vector<2x128xf32> to vector<2x32xf32>
    %222 = arith.mulf %219, %205 : vector<2x32xf32>
    %223 = arith.mulf %218, %220 : vector<2x32xf32>
    %224 = arith.addf %222, %223 : vector<2x32xf32>
    %225 = math.tanh %224 : vector<2x32xf32>
    %226 = arith.mulf %221, %225 : vector<2x32xf32>
    %227 = vector.extract_strided_slice %186 {offsets = [4, 0], sizes = [2, 128], strides = [1, 1]} : vector<16x128xf32> to vector<2x128xf32>
    %228 = arith.truncf %226 : vector<2x32xf32> to vector<2x32xbf16>
    %cst_64 = arith.constant dense<0.000000e+00> : vector<2x128xf32>
    %229 = tpu.matmul %228, %181, %cst_64 {dimension_numbers = #tpu.dot_dimension_numbers<[1], [0], [0], [1], [0, 0, 1, 1], [], []>} : vector<2x32xbf16>, vector<32x128xbf16>, vector<2x128xf32> -> vector<2x128xf32>
    %230 = arith.addf %227, %229 : vector<2x128xf32>
    %231 = arith.negf %230 : vector<2x128xf32>
    %232 = math.exp %231 : vector<2x128xf32>
    %cst_65 = arith.constant 1.000000e+00 : f32
    %233 = vector.broadcast %cst_65 : f32 to vector<2x128xf32>
    %234 = arith.addf %233, %232 : vector<2x128xf32>
    %235 = arith.divf %233, %234 : vector<2x128xf32>
    %236 = math.tanh %230 : vector<2x128xf32>
    %237 = vector.extract_strided_slice %235 {offsets = [0, 0], sizes = [2, 32], strides = [1, 1]} : vector<2x128xf32> to vector<2x32xf32>
    %238 = vector.extract_strided_slice %235 {offsets = [0, 32], sizes = [2, 32], strides = [1, 1]} : vector<2x128xf32> to vector<2x32xf32>
    %239 = vector.extract_strided_slice %236 {offsets = [0, 64], sizes = [2, 32], strides = [1, 1]} : vector<2x128xf32> to vector<2x32xf32>
    %240 = vector.extract_strided_slice %235 {offsets = [0, 96], sizes = [2, 32], strides = [1, 1]} : vector<2x128xf32> to vector<2x32xf32>
    %241 = arith.mulf %238, %224 : vector<2x32xf32>
    %242 = arith.mulf %237, %239 : vector<2x32xf32>
    %243 = arith.addf %241, %242 : vector<2x32xf32>
    %244 = math.tanh %243 : vector<2x32xf32>
    %245 = arith.mulf %240, %244 : vector<2x32xf32>
    %246 = vector.extract_strided_slice %186 {offsets = [6, 0], sizes = [2, 128], strides = [1, 1]} : vector<16x128xf32> to vector<2x128xf32>
    %247 = arith.truncf %245 : vector<2x32xf32> to vector<2x32xbf16>
    %cst_66 = arith.constant dense<0.000000e+00> : vector<2x128xf32>
    %248 = tpu.matmul %247, %181, %cst_66 {dimension_numbers = #tpu.dot_dimension_numbers<[1], [0], [0], [1], [0, 0, 1, 1], [], []>} : vector<2x32xbf16>, vector<32x128xbf16>, vector<2x128xf32> -> vector<2x128xf32>
    %249 = arith.addf %246, %248 : vector<2x128xf32>
    %250 = arith.negf %249 : vector<2x128xf32>
    %251 = math.exp %250 : vector<2x128xf32>
    %cst_67 = arith.constant 1.000000e+00 : f32
    %252 = vector.broadcast %cst_67 : f32 to vector<2x128xf32>
    %253 = arith.addf %252, %251 : vector<2x128xf32>
    %254 = arith.divf %252, %253 : vector<2x128xf32>
    %255 = math.tanh %249 : vector<2x128xf32>
    %256 = vector.extract_strided_slice %254 {offsets = [0, 0], sizes = [2, 32], strides = [1, 1]} : vector<2x128xf32> to vector<2x32xf32>
    %257 = vector.extract_strided_slice %254 {offsets = [0, 32], sizes = [2, 32], strides = [1, 1]} : vector<2x128xf32> to vector<2x32xf32>
    %258 = vector.extract_strided_slice %255 {offsets = [0, 64], sizes = [2, 32], strides = [1, 1]} : vector<2x128xf32> to vector<2x32xf32>
    %259 = vector.extract_strided_slice %254 {offsets = [0, 96], sizes = [2, 32], strides = [1, 1]} : vector<2x128xf32> to vector<2x32xf32>
    %260 = arith.mulf %257, %243 : vector<2x32xf32>
    %261 = arith.mulf %256, %258 : vector<2x32xf32>
    %262 = arith.addf %260, %261 : vector<2x32xf32>
    %263 = math.tanh %262 : vector<2x32xf32>
    %264 = arith.mulf %259, %263 : vector<2x32xf32>
    %265 = vector.extract_strided_slice %186 {offsets = [8, 0], sizes = [2, 128], strides = [1, 1]} : vector<16x128xf32> to vector<2x128xf32>
    %266 = arith.truncf %264 : vector<2x32xf32> to vector<2x32xbf16>
    %cst_68 = arith.constant dense<0.000000e+00> : vector<2x128xf32>
    %267 = tpu.matmul %266, %181, %cst_68 {dimension_numbers = #tpu.dot_dimension_numbers<[1], [0], [0], [1], [0, 0, 1, 1], [], []>} : vector<2x32xbf16>, vector<32x128xbf16>, vector<2x128xf32> -> vector<2x128xf32>
    %268 = arith.addf %265, %267 : vector<2x128xf32>
    %269 = arith.negf %268 : vector<2x128xf32>
    %270 = math.exp %269 : vector<2x128xf32>
    %cst_69 = arith.constant 1.000000e+00 : f32
    %271 = vector.broadcast %cst_69 : f32 to vector<2x128xf32>
    %272 = arith.addf %271, %270 : vector<2x128xf32>
    %273 = arith.divf %271, %272 : vector<2x128xf32>
    %274 = math.tanh %268 : vector<2x128xf32>
    %275 = vector.extract_strided_slice %273 {offsets = [0, 0], sizes = [2, 32], strides = [1, 1]} : vector<2x128xf32> to vector<2x32xf32>
    %276 = vector.extract_strided_slice %273 {offsets = [0, 32], sizes = [2, 32], strides = [1, 1]} : vector<2x128xf32> to vector<2x32xf32>
    %277 = vector.extract_strided_slice %274 {offsets = [0, 64], sizes = [2, 32], strides = [1, 1]} : vector<2x128xf32> to vector<2x32xf32>
    %278 = vector.extract_strided_slice %273 {offsets = [0, 96], sizes = [2, 32], strides = [1, 1]} : vector<2x128xf32> to vector<2x32xf32>
    %279 = arith.mulf %276, %262 : vector<2x32xf32>
    %280 = arith.mulf %275, %277 : vector<2x32xf32>
    %281 = arith.addf %279, %280 : vector<2x32xf32>
    %282 = math.tanh %281 : vector<2x32xf32>
    %283 = arith.mulf %278, %282 : vector<2x32xf32>
    %284 = vector.extract_strided_slice %186 {offsets = [10, 0], sizes = [2, 128], strides = [1, 1]} : vector<16x128xf32> to vector<2x128xf32>
    %285 = arith.truncf %283 : vector<2x32xf32> to vector<2x32xbf16>
    %cst_70 = arith.constant dense<0.000000e+00> : vector<2x128xf32>
    %286 = tpu.matmul %285, %181, %cst_70 {dimension_numbers = #tpu.dot_dimension_numbers<[1], [0], [0], [1], [0, 0, 1, 1], [], []>} : vector<2x32xbf16>, vector<32x128xbf16>, vector<2x128xf32> -> vector<2x128xf32>
    %287 = arith.addf %284, %286 : vector<2x128xf32>
    %288 = arith.negf %287 : vector<2x128xf32>
    %289 = math.exp %288 : vector<2x128xf32>
    %cst_71 = arith.constant 1.000000e+00 : f32
    %290 = vector.broadcast %cst_71 : f32 to vector<2x128xf32>
    %291 = arith.addf %290, %289 : vector<2x128xf32>
    %292 = arith.divf %290, %291 : vector<2x128xf32>
    %293 = math.tanh %287 : vector<2x128xf32>
    %294 = vector.extract_strided_slice %292 {offsets = [0, 0], sizes = [2, 32], strides = [1, 1]} : vector<2x128xf32> to vector<2x32xf32>
    %295 = vector.extract_strided_slice %292 {offsets = [0, 32], sizes = [2, 32], strides = [1, 1]} : vector<2x128xf32> to vector<2x32xf32>
    %296 = vector.extract_strided_slice %293 {offsets = [0, 64], sizes = [2, 32], strides = [1, 1]} : vector<2x128xf32> to vector<2x32xf32>
    %297 = vector.extract_strided_slice %292 {offsets = [0, 96], sizes = [2, 32], strides = [1, 1]} : vector<2x128xf32> to vector<2x32xf32>
    %298 = arith.mulf %295, %281 : vector<2x32xf32>
    %299 = arith.mulf %294, %296 : vector<2x32xf32>
    %300 = arith.addf %298, %299 : vector<2x32xf32>
    %301 = math.tanh %300 : vector<2x32xf32>
    %302 = arith.mulf %297, %301 : vector<2x32xf32>
    %303 = vector.extract_strided_slice %186 {offsets = [12, 0], sizes = [2, 128], strides = [1, 1]} : vector<16x128xf32> to vector<2x128xf32>
    %304 = arith.truncf %302 : vector<2x32xf32> to vector<2x32xbf16>
    %cst_72 = arith.constant dense<0.000000e+00> : vector<2x128xf32>
    %305 = tpu.matmul %304, %181, %cst_72 {dimension_numbers = #tpu.dot_dimension_numbers<[1], [0], [0], [1], [0, 0, 1, 1], [], []>} : vector<2x32xbf16>, vector<32x128xbf16>, vector<2x128xf32> -> vector<2x128xf32>
    %306 = arith.addf %303, %305 : vector<2x128xf32>
    %307 = arith.negf %306 : vector<2x128xf32>
    %308 = math.exp %307 : vector<2x128xf32>
    %cst_73 = arith.constant 1.000000e+00 : f32
    %309 = vector.broadcast %cst_73 : f32 to vector<2x128xf32>
    %310 = arith.addf %309, %308 : vector<2x128xf32>
    %311 = arith.divf %309, %310 : vector<2x128xf32>
    %312 = math.tanh %306 : vector<2x128xf32>
    %313 = vector.extract_strided_slice %311 {offsets = [0, 0], sizes = [2, 32], strides = [1, 1]} : vector<2x128xf32> to vector<2x32xf32>
    %314 = vector.extract_strided_slice %311 {offsets = [0, 32], sizes = [2, 32], strides = [1, 1]} : vector<2x128xf32> to vector<2x32xf32>
    %315 = vector.extract_strided_slice %312 {offsets = [0, 64], sizes = [2, 32], strides = [1, 1]} : vector<2x128xf32> to vector<2x32xf32>
    %316 = vector.extract_strided_slice %311 {offsets = [0, 96], sizes = [2, 32], strides = [1, 1]} : vector<2x128xf32> to vector<2x32xf32>
    %317 = arith.mulf %314, %300 : vector<2x32xf32>
    %318 = arith.mulf %313, %315 : vector<2x32xf32>
    %319 = arith.addf %317, %318 : vector<2x32xf32>
    %320 = math.tanh %319 : vector<2x32xf32>
    %321 = arith.mulf %316, %320 : vector<2x32xf32>
    %322 = vector.extract_strided_slice %186 {offsets = [14, 0], sizes = [2, 128], strides = [1, 1]} : vector<16x128xf32> to vector<2x128xf32>
    %323 = arith.truncf %321 : vector<2x32xf32> to vector<2x32xbf16>
    %cst_74 = arith.constant dense<0.000000e+00> : vector<2x128xf32>
    %324 = tpu.matmul %323, %181, %cst_74 {dimension_numbers = #tpu.dot_dimension_numbers<[1], [0], [0], [1], [0, 0, 1, 1], [], []>} : vector<2x32xbf16>, vector<32x128xbf16>, vector<2x128xf32> -> vector<2x128xf32>
    %325 = arith.addf %322, %324 : vector<2x128xf32>
    %326 = arith.negf %325 : vector<2x128xf32>
    %327 = math.exp %326 : vector<2x128xf32>
    %cst_75 = arith.constant 1.000000e+00 : f32
    %328 = vector.broadcast %cst_75 : f32 to vector<2x128xf32>
    %329 = arith.addf %328, %327 : vector<2x128xf32>
    %330 = arith.divf %328, %329 : vector<2x128xf32>
    %331 = math.tanh %325 : vector<2x128xf32>
    %332 = vector.extract_strided_slice %330 {offsets = [0, 0], sizes = [2, 32], strides = [1, 1]} : vector<2x128xf32> to vector<2x32xf32>
    %333 = vector.extract_strided_slice %330 {offsets = [0, 32], sizes = [2, 32], strides = [1, 1]} : vector<2x128xf32> to vector<2x32xf32>
    %334 = vector.extract_strided_slice %331 {offsets = [0, 64], sizes = [2, 32], strides = [1, 1]} : vector<2x128xf32> to vector<2x32xf32>
    %335 = vector.extract_strided_slice %330 {offsets = [0, 96], sizes = [2, 32], strides = [1, 1]} : vector<2x128xf32> to vector<2x32xf32>
    %336 = arith.mulf %333, %319 : vector<2x32xf32>
    %337 = arith.mulf %332, %334 : vector<2x32xf32>
    %338 = arith.addf %336, %337 : vector<2x32xf32>
    %339 = math.tanh %338 : vector<2x32xf32>
    %340 = arith.mulf %335, %339 : vector<2x32xf32>
    %c0_76 = arith.constant 0 : index
    %c0_77 = arith.constant 0 : index
    %341 = vector.load %arg8[%c0_76, %c0_77] : memref<32x4xbf16, #tpu.memory_space<vmem>>, vector<32x4xbf16>
    %c0_78 = arith.constant 0 : index
    %c0_79 = arith.constant 0 : index
    %342 = vector.load %arg9[%c0_78, %c0_79] : memref<1x4xf32, #tpu.memory_space<vmem>>, vector<1x4xf32>
    %343 = arith.truncf %340 : vector<2x32xf32> to vector<2x32xbf16>
    %cst_80 = arith.constant dense<0.000000e+00> : vector<2x4xf32>
    %344 = tpu.matmul %343, %341, %cst_80 {dimension_numbers = #tpu.dot_dimension_numbers<[1], [0], [0], [1], [0, 0, 1, 1], [], []>} : vector<2x32xbf16>, vector<32x4xbf16>, vector<2x4xf32> -> vector<2x4xf32>
    %345 = vector.broadcast %342 : vector<1x4xf32> to vector<2x4xf32>
    %346 = arith.addf %344, %345 : vector<2x4xf32>
    %c0_81 = arith.constant 0 : index
    %c0_82 = arith.constant 0 : index
    %347 = vector.load %arg10[%c0_81, %c0_82] : memref<2x4xf32, #tpu.memory_space<vmem>>, vector<2x4xf32>
    tpu.vector_store %arg10[%c0_81, %c0_82], %346 {strides = array<i32>} : memref<2x4xf32, #tpu.memory_space<vmem>>, vector<2x4xf32>,
    return
  }
  func.func @transform_0(%arg0: i32) -> (i32, i32, i32) {
    %c0_i32 = arith.constant 0 : i32
    %c0_i32_0 = arith.constant 0 : i32
    %c0_i32_1 = arith.constant 0 : i32
    return %arg0, %c0_i32, %c0_i32_0 : i32, i32, i32
  }
  func.func @transform_1(%arg0: i32) -> (i32, i32) {
    %c0_i32 = arith.constant 0 : i32
    %c0_i32_0 = arith.constant 0 : i32
    %c0_i32_1 = arith.constant 0 : i32
    return %c0_i32, %c0_i32_0 : i32, i32
  }
  func.func @transform_2(%arg0: i32) -> (i32, i32) {
    %c0_i32 = arith.constant 0 : i32
    %c0_i32_0 = arith.constant 0 : i32
    %c0_i32_1 = arith.constant 0 : i32
    return %c0_i32, %c0_i32_0 : i32, i32
  }
  func.func @transform_3(%arg0: i32) -> (i32, i32) {
    %c0_i32 = arith.constant 0 : i32
    %c0_i32_0 = arith.constant 0 : i32
    %c0_i32_1 = arith.constant 0 : i32
    return %c0_i32, %c0_i32_0 : i32, i32
  }
  func.func @transform_4(%arg0: i32) -> (i32, i32) {
    %c0_i32 = arith.constant 0 : i32
    %c0_i32_0 = arith.constant 0 : i32
    %c0_i32_1 = arith.constant 0 : i32
    return %c0_i32, %c0_i32_0 : i32, i32
  }
  func.func @transform_5(%arg0: i32) -> (i32, i32) {
    %c0_i32 = arith.constant 0 : i32
    %c0_i32_0 = arith.constant 0 : i32
    %c0_i32_1 = arith.constant 0 : i32
    return %c0_i32, %c0_i32_0 : i32, i32
  }
  func.func @transform_6(%arg0: i32) -> (i32, i32) {
    %c0_i32 = arith.constant 0 : i32
    %c0_i32_0 = arith.constant 0 : i32
    %c0_i32_1 = arith.constant 0 : i32
    return %c0_i32, %c0_i32_0 : i32, i32
  }
  func.func @transform_7(%arg0: i32) -> (i32, i32) {
    %c0_i32 = arith.constant 0 : i32
    %c0_i32_0 = arith.constant 0 : i32
    %c0_i32_1 = arith.constant 0 : i32
    return %c0_i32, %c0_i32_0 : i32, i32
  }
  func.func @transform_8(%arg0: i32) -> (i32, i32) {
    %c0_i32 = arith.constant 0 : i32
    %c0_i32_0 = arith.constant 0 : i32
    %c0_i32_1 = arith.constant 0 : i32
    return %c0_i32, %c0_i32_0 : i32, i32
  }
  func.func @transform_9(%arg0: i32) -> (i32, i32) {
    %c0_i32 = arith.constant 0 : i32
    %c0_i32_0 = arith.constant 0 : i32
    return %arg0, %c0_i32 : i32, i32
  }
}

</mosaic_0001>

<bundles_post_ra>
// kernel: _fused_forward.1
= control target key start
LH: loop header
LB: loop body
LE: loop exit
PB: predicated region body
PF: predicated region fallthrough
CT: control target
= control target key end

     0   :  { %14 = vsyncpa [#allocation5], 0  ;;  %s2499_s0 = inlined_call_operand.vmem [shape: f32[2,8,16], index: 0, kind: input, shape index: {}]   ;;  %s2500_s1 = inlined_call_operand.hbm [shape: bf16[16,128], index: 1, kind: input, shape index: {}]   ;;  %s2501_s2 = inlined_call_operand.vmem [shape: bf16[32,128], index: 2, kind: input, shape index: {}]   ;;  %s2502_s3 = inlined_call_operand.vmem [shape: f32[1,128], index: 3, kind: input, shape index: {}]   ;;  %s2503_s4 = inlined_call_operand.hbm [shape: bf16[32,128], index: 4, kind: input, shape index: {}]   ;;  %s2504_s5 = inlined_call_operand.hbm [shape: bf16[32,128], index: 5, kind: input, shape index: {}]   ;;  %s2505_s6 = inlined_call_operand.vmem [shape: f32[1,128], index: 6, kind: input, shape index: {}]   ;;  %s2506_s7 = inlined_call_operand.vmem [shape: bf16[32,4], index: 7, kind: input, shape index: {}]   ;;  %s2507_s8 = inlined_call_operand.hbm [shape: f32[1,4], index: 8, kind: input, shape index: {}]   ;;  %s2508_s9 = inlined_call_operand.hbm [shape: f32[2,4], index: 9, kind: output, shape index: {}]  }
   0x1   :  { %15 = vsyncpa [#allocation8], 0 }
   0x2   :  { %16 = vsyncpa [#allocation11], 0 }
   0x3   :  { %17 = vsyncpa [#allocation6], 0  ;;  %s2107_s30 = smov [#allocation7]   ;;  %s2108_s11 = smov [#allocation4]  }
   0x4   :  { %s41_s10 = sshll.u32 %s2107_s30, 4  ;;  %s25_s12 = sshll.u32 %s2108_s11, 4  ;;  %s42_s10 = int_to_ptr.vmem [resolvable:$true] %s41_s10  ;;  %s2168_s12 = int_to_ptr.vmem [resolvable:$true] %s25_s12 }
   0x5   :  { %s1989_s15 = scalar_lea.hbm %s2503_s4, 256 }
   0x6   :  { %p1990_p0 = scmp.ne.s32.totalorder %s2503_s4, %s1989_s15  ;;  %p1993_p1 = scmp.lt.u32.totalorder %s1989_s15, %s2503_s4 }
   0x8   :  { %p1995_p2 = pnand %p1993_p1, %p1990_p0 }
   0xa   :  { %1998 = shalt.err (!%p1995_p2)
}
   0xb   :  { %s1999_s20 = scalar_lea.vmem %s42_s10, 256  ;;  %p2004_p4 = scmp.lt.s32.totalorder %s42_s10, %s42_s10 }
   0xc   :  { %p2000_p3 = scmp.ne.s32.totalorder %s42_s10, %s1999_s20  ;;  %p2005_p5 = scmp.lt.s32.totalorder %s1999_s20, %s1999_s20 }
   0xe   :  { %p2006_p6 = por %p2005_p5, %p2004_p4 }
  0x10   :  { %p2007_p7 = pnand %p2006_p6, %p2000_p3 }
  0x12   :  { %2010 = shalt.err (!%p2007_p7)
}
  0x13   :  { %s2109_s21 = smov 64   ;;  %s2110_s22 = smov 4  }
  0x14   :  { %47 = dma.hbm_to_vmem [thread:$0]  %s2503_s4, 256, %s42_s10, [#allocation8], %s2109_s21, %s2109_s21, %s2110_s22  }
  0x15   :  { %s2011_s27 = scalar_lea.hbm %s2500_s1, 128 }
  0x16   :  { %p2012_p8 = scmp.ne.s32.totalorder %s2500_s1, %s2011_s27  ;;  %p2015_p9 = scmp.lt.u32.totalorder %s2011_s27, %s2500_s1 }
  0x18   :  { %p2017_p10 = pnand %p2015_p9, %p2012_p8 }
  0x1a   :  { %2020 = shalt.err (!%p2017_p10)
}
  0x1b   :  { %s2021_s13 = scalar_lea.vmem %s2168_s12, 128  ;;  %p2026_p12 = scmp.lt.s32.totalorder %s2168_s12, %s2168_s12 }
  0x1c   :  { %p2022_p11 = scmp.ne.s32.totalorder %s2168_s12, %s2021_s13  ;;  %p2027_p13 = scmp.lt.s32.totalorder %s2021_s13, %s2021_s13 }
  0x1e   :  { %p2028_p0 = por %p2027_p13, %p2026_p12 }
  0x20   :  { %p2029_p1 = pnand %p2028_p0, %p2022_p11 }
  0x22   :  { %2032 = shalt.err (!%p2029_p1)
}
  0x23   :  { %31 = dma.hbm_to_vmem [thread:$0]  %s2500_s1, 128, %s2168_s12, [#allocation5], %s2109_s21, %s2109_s21, %s2110_s22  }
  0x24   :  { %s2111_s14 = smov [#allocation9]   ;;  %s2112_s16 = smov [#allocation10]  }
  0x25   :  { %s53_s15 = sshll.u32 %s2111_s14, 4  ;;  %s70_s17 = sshll.u32 %s2112_s16, 4  ;;  %s54_s15 = int_to_ptr.vmem [resolvable:$true] %s53_s15  ;;  %s71_s17 = int_to_ptr.vmem [resolvable:$true] %s70_s17 }
  0x26   :  { %s2033_s20 = scalar_lea.hbm %s2504_s5, 256 }
  0x27   :  { %p2034_p2 = scmp.ne.s32.totalorder %s2504_s5, %s2033_s20  ;;  %p2037_p3 = scmp.lt.u32.totalorder %s2033_s20, %s2504_s5 }
  0x29   :  { %p2039_p4 = pnand %p2037_p3, %p2034_p2 }
  0x2b   :  { %2042 = shalt.err (!%p2039_p4)
}
  0x2c   :  { %s2043_s1 = scalar_lea.vmem %s54_s15, 256  ;;  %p2048_p6 = scmp.lt.s32.totalorder %s54_s15, %s54_s15 }
  0x2d   :  { %p2044_p5 = scmp.ne.s32.totalorder %s54_s15, %s2043_s1  ;;  %p2049_p7 = scmp.lt.s32.totalorder %s2043_s1, %s2043_s1 }
  0x2f   :  { %p2050_p8 = por %p2049_p7, %p2048_p6 }
  0x31   :  { %p2051_p9 = pnand %p2050_p8, %p2044_p5 }
  0x33   :  { %2054 = shalt.err (!%p2051_p9)
}
  0x34   :  { %59 = dma.hbm_to_vmem [thread:$0]  %s2504_s5, 256, %s54_s15, [#allocation8], %s2109_s21, %s2109_s21, %s2110_s22  }
  0x35   :  { %s2055_s30 = scalar_lea.hbm %s2507_s8, 16 }
  0x36   :  { %p2056_p10 = scmp.ne.s32.totalorder %s2507_s8, %s2055_s30  ;;  %p2059_p11 = scmp.lt.u32.totalorder %s2055_s30, %s2507_s8 }
  0x38   :  { %p2061_p12 = pnand %p2059_p11, %p2056_p10 }
  0x3a   :  { %2064 = shalt.err (!%p2061_p12)
}
  0x3b   :  { %s2065_s14 = scalar_lea.vmem %s71_s17, 16  ;;  %s2069_s16 = scalar_lea.vmem %s71_s17, 32 }
  0x3c   :  { %p2066_p13 = scmp.ne.s32.totalorder %s71_s17, %s2065_s14  ;;  %p2070_p0 = scmp.lt.s32.totalorder %s71_s17, %s71_s17 }
  0x3d   :  { %p2071_p1 = scmp.lt.s32.totalorder %s2069_s16, %s2065_s14 }
  0x3f   :  { %p2072_p2 = por %p2071_p1, %p2070_p0 }
  0x41   :  { %p2073_p3 = pnand %p2072_p2, %p2066_p13 }
  0x43   :  { %2076 = shalt.err (!%p2073_p3)
}
  0x44   :  { %73 = dma.hbm_to_vmem [thread:$0]  %s2507_s8, 16, %s71_s17, [#allocation11]  }
  0x45   :  { %2099 = dma.done.wait [#allocation5], 128  }
  0x46   :  { %2100 = vsyncadd [#allocation5], 4294967168 }
  0x47   :  { %2101 = dma.done.wait [#allocation8], 512  }
  0x48   :  { %2102 = vsyncadd [#allocation8], 4294966784 }
  0x49   :  { %2103 = dma.done.wait [#allocation11], 16  }
  0x4a   :  { %2104 = vsyncadd [#allocation11], 4294967280  ;;  %v2113_v0 = vmov 0.0   ;;  %vm2114_vm0 = vmmov 0   ;;  %v1852_v1 = vld [vmem:[#allocation4] sm:$0xff]   ;;  %v94_v2 = vld [vmem:[%s2499_s0] sm:$0xff] }
  0x4b   :  { %1691 = vmatprep.subr.bf16.mxu0 %v2113_v0  ;;  %1693 = vmatprep.mubr.msk.bf16.mxu0 %vm2114_vm0, %v2113_v0  ;;  %v95_v3 = vld [vmem:[%s2499_s0 + $0x8] sm:$0xff]  ;;  %vm109_vm1 = vcmask 130048   ;;  %v2247_v5 = vld [vmem:[%s2501_s2] sm:$0xff]   ;;  %v2115_v7 = vmov 0   ;;  %vm243_vm2 = vcmask 253952   ;;  %vm169_vm3 = vcmask 261120  }
  0x4c   :  { %1697 = vmatprep.subr.bf16.mxu1 %v2113_v0  ;;  %1701 = vmatprep.mubr.msk.bf16.mxu1 %vm2114_vm0, %v2113_v0  ;;  %v96_v4 = vpack.c.bf16 %v95_v3, %v94_v2  ;;  %v2252_v6 = vld [vmem:[%s2501_s2 + $0x8] sm:$0xff]   ;;  %v1590_v8 = vld [vmem:[%s2502_s3] ss:$0 sm:$0xff]  ;;  %s2116_s3 = smov 32   ;;  %vm321_vm4 = vcmask 254977   ;;  %vm481_vm5 = vcmask 257027  }
  0x4d   :  { %1692 = vmatpush3.bf16.msra.mxu0 %v1852_v1  ;;  %1698 = vmatpush3.bf16.msra.mxu1 %v2247_v5  ;;  %vm641_vm6 = vcmask 259077   ;;  %vm401_vm7 = vcmask 256002   ;;  %vm561_vm8 = vcmask 258052   ;;  %vm721_vm9 = vcmask 260102   ;;  %s2117_s28 = smov [#allocation12]  }
  0x4e   :  { %1705 = vmatprep.subr.bf16.mxu0 %v2113_v0  ;;  %1699 = vmatprep.subr.bf16.mxu1 %v2113_v0  ;;  %vm801_vm10 = vcmask 261127   ;;  %s1579_s29 = sshll.u32 %s2117_s28, 4  ;;  %vm1571_vm11 = vcmask 25600   ;;  %s1580_s29 = int_to_ptr.vmem [resolvable:$true] %s1579_s29 }
  0x4f   :  { %p2082_p5 = scmp.lt.s32.totalorder %s1580_s29, %s1580_s29 }
  0x50   :  { %1694 = vmatmul.mubr.msk.bf16.vlgmr.msra.gmra.mrb[0].mxu0 %vm109_vm1, %v96_v4 }
  0x51   :  { %1706 = vmatpush3.bf16.msra.mxu0 %v2247_v5  ;;  %1709 = vmatprep.mubr.msk.bf16.mxu0 %vm2114_vm0, %v2113_v0 }
  0x52   :  { %1707 = vmatprep.subr.bf16.mxu0 %v2113_v0  ;;  %1700 = vmatpush3.bf16.msra.mxu1 %v2252_v6 }
  0x53   :  { %1713 = vmatprep.subr.bf16.mxu1 %v2113_v0 }
  0x55   :  { %1708 = vmatpush3.bf16.msra.mxu0 %v2252_v6  ;;  %1702 = vmatmul.mubr.bf16.vlgmr.msra.gmra.mrb[0].mxu1 %v2115_v7 }
  0x56   :  { %1721 = vmatprep.subr.bf16.mxu0 %v2113_v0  ;;  %1714 = vmatpush3.bf16.msra.mxu1 %v2247_v5 }
  0x57   :  { %1717 = vmatprep.mubr.msk.bf16.mxu1 %vm2114_vm0, %v2113_v0  ;;  %1715 = vmatprep.subr.bf16.mxu1 %v2113_v0 }
  0x5a   :  { %1716 = vmatpush3.bf16.msra.mxu1 %v2252_v6 }
  0x5b   :  { %1729 = vmatprep.subr.bf16.mxu1 %v2113_v0 }
 0x123   :  { %v147_v9 = vpop.f32.mrb[0].mxu0 }
 0x124   :  { %v148_v10 = vadd.f32 %v1590_v8, %v147_v9  ;;  %v1695_v11 = vpop.f32.mrb[1].mxu0 }
 0x125   :  { %v150_v12 = vpop.f32.mrb[2].mxu0 }
 0x126   :  { %154 = vst [vmem:[#allocation2] sm:$0xff] %v148_v10  ;;  %v151_v13 = vadd.f32 %v1590_v8, %v150_v12  ;;  %v1696_v14 = vpop.f32.mrb[3].mxu0 }
 0x128   :  { %155 = vst [vmem:[#allocation2 + $0x8] sm:$0xff] %v151_v13  ;;  %v207_v15 = vpop.f32.mrb[0].mxu1 }
 0x129   :  { %v1703_v16 = vpop.f32.mrb[1].mxu1 }
 0x12a   :  { %v210_v17 = vpop.f32.mrb[2].mxu1 }
 0x12b   :  { %v1704_v18 = vpop.f32.mrb[3].mxu1 }
 0x12f   :  { %v156_v19 = vld [vmem:[#allocation2] ss:$8 sm:$0x3]  ;;  %v246_v36 = vld [vmem:[#allocation2 + $0x1] ss:$8 sm:$0x3] }
 0x130   :  { %v213_v20 = vadd.f32 %v207_v15, %v156_v19  ;;  %v324_v57 = vld [vmem:[#allocation2 + $0x2] ss:$8 sm:$0x3]  ;;  %v404_v18 = vld [vmem:[#allocation2 + $0x3] ss:$8 sm:$0x3] }
 0x132   :  { %1861 = vtanh.f32 %v213_v20  ;;  %v1595_v22 = vmul.f32 -1.442695, %v213_v20 }
 0x134   :  { %1863 = vpow2.f32 %v1595_v22 }
 0x13c   :  { %v1862_v21 = vpop.eup %1861 }
 0x13d   :  { %223 = vrot.lane.b32.xlu0 %v1862_v21, %s2109_s21 }
 0x13e   :  { %v1864_v23 = vpop.eup %1863 }
 0x13f   :  { %v217_v24 = vadd.f32 1.0, %v1864_v23 }
 0x141   :  { %1865 = vrcp.f32 %v217_v24 }
 0x14b   :  { %v1866_v25 = vpop.eup %1865 }
 0x14c   :  { %v221_v28 = vmul.f32 0.0, %v1866_v25 }
 0x1af   :  { %v224_v26 = vpop.permute.xlu0 %223 }
 0x1b0   :  { %v226_v27 = vmul.f32 %v1866_v25, %v224_v26 }
 0x1b2   :  { %228 = vrot.lane.b32.xlu0 %v226_v27, %s2116_s3 }
 0x224   :  { %v229_v29 = vpop.permute.xlu0 %228 }
 0x225   :  { %v231_v30 = vadd.f32 %v229_v29, %v221_v28 }
 0x227   :  { %1867 = vtanh.f32 %v231_v30 }
 0x231   :  { %v1868_v31 = vpop.eup %1867 }
 0x232   :  { %234 = vrot.lane.b32.xlu1 %v1868_v31, %s2109_s21 }
 0x2a4   :  { %v235_v32 = vpop.permute.xlu1 %234 }
 0x2a5   :  { %v237_v33 = vmul.f32 %v1866_v25, %v235_v32 }
 0x2a7   :  { %v238_v34 = vpack.c.bf16 %v237_v33, %v237_v33 }
 0x2a9   :  { %240 = vrot.lane.b32.xlu1 %v238_v34, %s2116_s3 }
 0x31b   :  { %v241_v35 = vpop.permute.xlu1 %240 }
 0x31c   :  { %244 = vst.msk [vmem:[#allocation3] sm:$0x1] %vm243_vm2, %v241_v35  ;;  %1710 = vmatmul.mubr.msk.bf16.vlgmr.msra.gmra.mrb[4].mxu0 %vm169_vm3, %v241_v35 }
 0x31d   :  { %1722 = vmatpush3.bf16.msra.mxu0 %v2247_v5  ;;  %1725 = vmatprep.mubr.msk.bf16.mxu0 %vm2114_vm0, %v2113_v0 }
 0x31e   :  { %1723 = vmatprep.subr.bf16.mxu0 %v2113_v0 }
 0x321   :  { %1724 = vmatpush3.bf16.msra.mxu0 %v2252_v6 }
 0x322   :  { %1737 = vmatprep.subr.bf16.mxu0 %v2113_v0 }
 0x3ef   :  { %v284_v37 = vpop.f32.mrb[4].mxu0 }
 0x3f0   :  { %v290_v38 = vadd.f32 %v284_v37, %v246_v36  ;;  %v1711_v39 = vpop.f32.mrb[5].mxu0 }
 0x3f1   :  { %v287_v40 = vpop.f32.mrb[6].mxu0  ;;  %v484_v39 = vld [vmem:[#allocation2 + $0x4] ss:$8 sm:$0x3] }
 0x3f2   :  { %1869 = vtanh.f32 %v290_v38  ;;  %v1712_v41 = vpop.f32.mrb[7].mxu0  ;;  %v1597_v43 = vmul.f32 -1.442695, %v290_v38 }
 0x3f4   :  { %1871 = vpow2.f32 %v1597_v43 }
 0x3fc   :  { %v1870_v42 = vpop.eup %1869 }
 0x3fd   :  { %300 = vrot.lane.b32.xlu0 %v1870_v42, %s2109_s21 }
 0x3fe   :  { %v1872_v44 = vpop.eup %1871 }
 0x3ff   :  { %v294_v45 = vadd.f32 1.0, %v1872_v44 }
 0x401   :  { %1873 = vrcp.f32 %v294_v45 }
 0x40b   :  { %v1874_v46 = vpop.eup %1873 }
 0x40c   :  { %v298_v49 = vmul.f32 %v1874_v46, %v231_v30 }
 0x46f   :  { %v301_v47 = vpop.permute.xlu0 %300 }
 0x470   :  { %v303_v48 = vmul.f32 %v1874_v46, %v301_v47 }
 0x472   :  { %305 = vrot.lane.b32.xlu1 %v303_v48, %s2116_s3 }
 0x4e4   :  { %v306_v50 = vpop.permute.xlu1 %305 }
 0x4e5   :  { %v308_v51 = vadd.f32 %v306_v50, %v298_v49 }
 0x4e7   :  { %1875 = vtanh.f32 %v308_v51 }
 0x4f1   :  { %v1876_v52 = vpop.eup %1875 }
 0x4f2   :  { %311 = vrot.lane.b32.xlu0 %v1876_v52, %s2109_s21 }
 0x564   :  { %v312_v53 = vpop.permute.xlu0 %311 }
 0x565   :  { %v314_v54 = vmul.f32 %v1874_v46, %v312_v53 }
 0x567   :  { %v2289_v55 = vpack.c.bf16 %v314_v54, %v314_v54 }
 0x569   :  { %325 = vrot.lane.b32.xlu1 %v2289_v55, %s2116_s3 }
 0x5db   :  { %v326_v56 = vpop.permute.xlu1 %325 }
 0x5dc   :  { %1718 = vmatmul.mubr.msk.bf16.vlgmr.msra.gmra.mrb[4].mxu1 %vm169_vm3, %v326_v56 }
 0x5dd   :  { %1730 = vmatpush3.bf16.msra.mxu1 %v2247_v5  ;;  %1733 = vmatprep.mubr.msk.bf16.mxu1 %vm2114_vm0, %v2113_v0 }
 0x5de   :  { %1731 = vmatprep.subr.bf16.mxu1 %v2113_v0 }
 0x5e1   :  { %1732 = vmatpush3.bf16.msra.mxu1 %v2252_v6 }
 0x5e2   :  { %1745 = vmatprep.subr.bf16.mxu1 %v2113_v0 }
 0x6af   :  { %v364_v58 = vpop.f32.mrb[4].mxu1 }
 0x6b0   :  { %v370_v59 = vadd.f32 %v364_v58, %v324_v57  ;;  %v1719_v60 = vpop.f32.mrb[5].mxu1 }
 0x6b1   :  { %v367_v61 = vpop.f32.mrb[6].mxu1 }
 0x6b2   :  { %1877 = vtanh.f32 %v370_v59  ;;  %v1720_v62 = vpop.f32.mrb[7].mxu1  ;;  %v1599_v1 = vmul.f32 -1.442695, %v370_v59  ;;  %v564_v61 = vld [vmem:[#allocation2 + $0x5] ss:$8 sm:$0x3] }
 0x6b4   :  { %1879 = vpow2.f32 %v1599_v1 }
 0x6bc   :  { %v1878_v63 = vpop.eup %1877 }
 0x6bd   :  { %380 = vrot.lane.b32.xlu0 %v1878_v63, %s2109_s21 }
 0x6be   :  { %v1880_v2 = vpop.eup %1879 }
 0x6bf   :  { %v374_v3 = vadd.f32 1.0, %v1880_v2 }
 0x6c1   :  { %1881 = vrcp.f32 %v374_v3 }
 0x6cb   :  { %v1882_v4 = vpop.eup %1881 }
 0x6cc   :  { %v378_v10 = vmul.f32 %v1882_v4, %v308_v51 }
 0x72f   :  { %v381_v8 = vpop.permute.xlu0 %380 }
 0x730   :  { %v383_v9 = vmul.f32 %v1882_v4, %v381_v8 }
 0x732   :  { %385 = vrot.lane.b32.xlu1 %v383_v9, %s2116_s3 }
 0x7a4   :  { %v386_v11 = vpop.permute.xlu1 %385 }
 0x7a5   :  { %v388_v12 = vadd.f32 %v386_v11, %v378_v10 }
 0x7a7   :  { %1883 = vtanh.f32 %v388_v12 }
 0x7b1   :  { %v1884_v13 = vpop.eup %1883 }
 0x7b2   :  { %391 = vrot.lane.b32.xlu0 %v1884_v13, %s2109_s21 }
 0x824   :  { %v392_v14 = vpop.permute.xlu0 %391 }
 0x825   :  { %v394_v15 = vmul.f32 %v1882_v4, %v392_v14 }
 0x827   :  { %v2303_v16 = vpack.c.bf16 %v394_v15, %v394_v15 }
 0x829   :  { %405 = vrot.lane.b32.xlu1 %v2303_v16, %s2116_s3 }
 0x89b   :  { %v406_v17 = vpop.permute.xlu1 %405 }
 0x89c   :  { %1726 = vmatmul.mubr.msk.bf16.vlgmr.msra.gmra.mrb[8].mxu0 %vm169_vm3, %v406_v17 }
 0x89d   :  { %1738 = vmatpush3.bf16.msra.mxu0 %v2247_v5  ;;  %1741 = vmatprep.mubr.msk.bf16.mxu0 %vm2114_vm0, %v2113_v0 }
 0x89e   :  { %1739 = vmatprep.subr.bf16.mxu0 %v2113_v0 }
 0x8a1   :  { %1740 = vmatpush3.bf16.msra.mxu0 %v2252_v6 }
 0x8a2   :  { %1753 = vmatprep.subr.bf16.mxu0 %v2113_v0 }
 0x96f   :  { %v444_v19 = vpop.f32.mrb[8].mxu0 }
 0x970   :  { %v450_v20 = vadd.f32 %v444_v19, %v404_v18  ;;  %v1727_v21 = vpop.f32.mrb[9].mxu0 }
 0x971   :  { %v447_v22 = vpop.f32.mrb[10].mxu0  ;;  %v644_v21 = vld [vmem:[#allocation2 + $0x6] ss:$8 sm:$0x3] }
 0x972   :  { %1885 = vtanh.f32 %v450_v20  ;;  %v1728_v23 = vpop.f32.mrb[11].mxu0  ;;  %v1601_v25 = vmul.f32 -1.442695, %v450_v20 }
 0x974   :  { %1887 = vpow2.f32 %v1601_v25 }
 0x97c   :  { %v1886_v24 = vpop.eup %1885 }
 0x97d   :  { %460 = vrot.lane.b32.xlu0 %v1886_v24, %s2109_s21 }
 0x97e   :  { %v1888_v26 = vpop.eup %1887 }
 0x97f   :  { %v454_v27 = vadd.f32 1.0, %v1888_v26 }
 0x981   :  { %1889 = vrcp.f32 %v454_v27 }
 0x98b   :  { %v1890_v28 = vpop.eup %1889 }
 0x98c   :  { %v458_v31 = vmul.f32 %v1890_v28, %v388_v12 }
 0x9ef   :  { %v461_v29 = vpop.permute.xlu0 %460 }
 0x9f0   :  { %v463_v30 = vmul.f32 %v1890_v28, %v461_v29 }
 0x9f2   :  { %465 = vrot.lane.b32.xlu1 %v463_v30, %s2116_s3 }
 0xa64   :  { %v466_v32 = vpop.permute.xlu1 %465 }
 0xa65   :  { %v468_v33 = vadd.f32 %v466_v32, %v458_v31 }
 0xa67   :  { %1891 = vtanh.f32 %v468_v33 }
 0xa71   :  { %v1892_v34 = vpop.eup %1891 }
 0xa72   :  { %471 = vrot.lane.b32.xlu0 %v1892_v34, %s2109_s21 }
 0xae4   :  { %v472_v35 = vpop.permute.xlu0 %471 }
 0xae5   :  { %v474_v36 = vmul.f32 %v1890_v28, %v472_v35 }
 0xae7   :  { %v2317_v37 = vpack.c.bf16 %v474_v36, %v474_v36 }
 0xae9   :  { %485 = vrot.lane.b32.xlu1 %v2317_v37, %s2116_s3 }
 0xb5b   :  { %v486_v38 = vpop.permute.xlu1 %485 }
 0xb5c   :  { %1734 = vmatmul.mubr.msk.bf16.vlgmr.msra.gmra.mrb[8].mxu1 %vm169_vm3, %v486_v38 }
 0xb5d   :  { %1746 = vmatpush3.bf16.msra.mxu1 %v2247_v5  ;;  %1749 = vmatprep.mubr.msk.bf16.mxu1 %vm2114_vm0, %v2113_v0 }
 0xb5e   :  { %1747 = vmatprep.subr.bf16.mxu1 %v2113_v0 }
 0xb61   :  { %1748 = vmatpush3.bf16.msra.mxu1 %v2252_v6 }
 0xb62   :  { %1761 = vmatprep.subr.bf16.mxu1 %v2113_v0 }
 0xc2f   :  { %v524_v40 = vpop.f32.mrb[8].mxu1 }
 0xc30   :  { %v530_v41 = vadd.f32 %v524_v40, %v484_v39  ;;  %v1735_v42 = vpop.f32.mrb[9].mxu1 }
 0xc31   :  { %v527_v43 = vpop.f32.mrb[10].mxu1 }
 0xc32   :  { %1893 = vtanh.f32 %v530_v41  ;;  %v1736_v44 = vpop.f32.mrb[11].mxu1  ;;  %v1603_v46 = vmul.f32 -1.442695, %v530_v41  ;;  %v724_v43 = vld [vmem:[#allocation2 + $0x7] ss:$8 sm:$0x3] }
 0xc34   :  { %1895 = vpow2.f32 %v1603_v46 }
 0xc3c   :  { %v1894_v45 = vpop.eup %1893 }
 0xc3d   :  { %540 = vrot.lane.b32.xlu0 %v1894_v45, %s2109_s21 }
 0xc3e   :  { %v1896_v47 = vpop.eup %1895 }
 0xc3f   :  { %v534_v48 = vadd.f32 1.0, %v1896_v47 }
 0xc41   :  { %1897 = vrcp.f32 %v534_v48 }
 0xc4b   :  { %v1898_v49 = vpop.eup %1897 }
 0xc4c   :  { %v538_v52 = vmul.f32 %v1898_v49, %v468_v33 }
 0xcaf   :  { %v541_v50 = vpop.permute.xlu0 %540 }
 0xcb0   :  { %v543_v51 = vmul.f32 %v1898_v49, %v541_v50 }
 0xcb2   :  { %545 = vrot.lane.b32.xlu1 %v543_v51, %s2116_s3 }
 0xd24   :  { %v546_v53 = vpop.permute.xlu1 %545 }
 0xd25   :  { %v548_v54 = vadd.f32 %v546_v53, %v538_v52 }
 0xd27   :  { %1899 = vtanh.f32 %v548_v54 }
 0xd31   :  { %v1900_v56 = vpop.eup %1899 }
 0xd32   :  { %551 = vrot.lane.b32.xlu0 %v1900_v56, %s2109_s21 }
 0xda4   :  { %v552_v57 = vpop.permute.xlu0 %551 }
 0xda5   :  { %v554_v58 = vmul.f32 %v1898_v49, %v552_v57  ;;  %v317_v57 = vrot.slane %v2289_v55, 7 }
 0xda7   :  { %v2331_v59 = vpack.c.bf16 %v554_v58, %v554_v58  ;;  %v477_v58 = vrot.slane %v2317_v37, 5  ;;  %v397_v37 = vrot.slane %v2303_v16, 6 }
 0xda9   :  { %565 = vrot.lane.b32.xlu1 %v2331_v59, %s2116_s3 }
 0xe1b   :  { %v566_v60 = vpop.permute.xlu1 %565 }
 0xe1c   :  { %1742 = vmatmul.mubr.msk.bf16.vlgmr.msra.gmra.mrb[12].mxu0 %vm169_vm3, %v566_v60 }
 0xe1d   :  { %1754 = vmatpush3.bf16.msra.mxu0 %v2247_v5  ;;  %1757 = vmatprep.mubr.msk.bf16.mxu0 %vm2114_vm0, %v2113_v0 }
 0xe1e   :  { %1755 = vmatprep.subr.bf16.mxu0 %v2113_v0 }
 0xe21   :  { %1756 = vmatpush3.bf16.msra.mxu0 %v2252_v6 }
 0xe22   :  { %1769 = vmatprep.subr.bf16.mxu0 %v2113_v0 }
 0xeef   :  { %v604_v62 = vpop.f32.mrb[12].mxu0 }
 0xef0   :  { %v610_v63 = vadd.f32 %v604_v62, %v564_v61  ;;  %v1743_v1 = vpop.f32.mrb[13].mxu0 }
 0xef1   :  { %v607_v2 = vpop.f32.mrb[14].mxu0 }
 0xef2   :  { %1901 = vtanh.f32 %v610_v63  ;;  %v1744_v3 = vpop.f32.mrb[15].mxu0  ;;  %v1605_v5 = vmul.f32 -1.442695, %v610_v63 }
 0xef4   :  { %1903 = vpow2.f32 %v1605_v5 }
 0xefc   :  { %v1902_v4 = vpop.eup %1901 }
 0xefd   :  { %620 = vrot.lane.b32.xlu0 %v1902_v4, %s2109_s21  ;;  %v557_v4 = vrot.slane %v2331_v59, 4 }
 0xefe   :  { %v1904_v8 = vpop.eup %1903 }
 0xeff   :  { %v614_v9 = vadd.f32 1.0, %v1904_v8  ;;  %v1855_v8 = vld [vmem:[#allocation7] sm:$0xff]  }
 0xf01   :  { %1905 = vrcp.f32 %v614_v9  ;;  %v2369_v9 = vld [vmem:[#allocation9] sm:$0xff]  }
 0xf0b   :  { %v1906_v10 = vpop.eup %1905 }
 0xf0c   :  { %v618_v12 = vmul.f32 %v1906_v10, %v548_v54 }
 0xf6f   :  { %v621_v11 = vpop.permute.xlu0 %620 }
 0xf70   :  { %v623_v6 = vmul.f32 %v1906_v10, %v621_v11  ;;  %v2372_v11 = vld [vmem:[#allocation9 + $0x8] sm:$0xff]  }
 0xf72   :  { %625 = vrot.lane.b32.xlu1 %v623_v6, %s2116_s3 }
 0xfe4   :  { %v626_v13 = vpop.permute.xlu1 %625 }
 0xfe5   :  { %v628_v14 = vadd.f32 %v626_v13, %v618_v12 }
 0xfe7   :  { %1907 = vtanh.f32 %v628_v14 }
 0xff1   :  { %v1908_v15 = vpop.eup %1907 }
 0xff2   :  { %631 = vrot.lane.b32.xlu0 %v1908_v15, %s2109_s21 }
0x1064   :  { %v632_v17 = vpop.permute.xlu0 %631 }
0x1065   :  { %v634_v18 = vmul.f32 %v1906_v10, %v632_v17  ;;  %v1857_v10 = vld [vmem:[#allocation7 + $0x8] sm:$0xff]  }
0x1067   :  { %v635_v19 = vpack.c.bf16 %v634_v18, %v634_v18 }
0x1069   :  { %645 = vrot.lane.b32.xlu1 %v635_v19, %s2116_s3  ;;  %v637_v60 = vrot.slane %v635_v19, 3 }
0x10db   :  { %v646_v20 = vpop.permute.xlu1 %645 }
0x10dc   :  { %1750 = vmatmul.mubr.msk.bf16.vlgmr.msra.gmra.mrb[12].mxu1 %vm169_vm3, %v646_v20 }
0x10dd   :  { %1765 = vmatprep.mubr.msk.bf16.mxu1 %vm2114_vm0, %v2113_v0  ;;  %1762 = vmatpush3.bf16.msra.mxu1 %v1855_v8 }
0x10de   :  { %1763 = vmatprep.subr.bf16.mxu1 %v2113_v0 }
0x10e1   :  { %1764 = vmatpush3.bf16.msra.mxu1 %v1857_v10 }
0x10e2   :  { %1777 = vmatprep.subr.bf16.mxu1 %v2113_v0 }
0x11af   :  { %v684_v22 = vpop.f32.mrb[12].mxu1 }
0x11b0   :  { %v690_v23 = vadd.f32 %v684_v22, %v644_v21  ;;  %v1751_v24 = vpop.f32.mrb[13].mxu1  ;;  %v1610_v22 = vld [vmem:[%s2505_s6] ss:$0 sm:$0xff] }
0x11b1   :  { %v687_v25 = vpop.f32.mrb[14].mxu1 }
0x11b2   :  { %1909 = vtanh.f32 %v690_v23  ;;  %v1752_v26 = vpop.f32.mrb[15].mxu1  ;;  %v1607_v28 = vmul.f32 -1.442695, %v690_v23 }
0x11b4   :  { %1911 = vpow2.f32 %v1607_v28 }
0x11bc   :  { %v1910_v27 = vpop.eup %1909 }
0x11bd   :  { %700 = vrot.lane.b32.xlu0 %v1910_v27, %s2109_s21 }
0x11be   :  { %v1912_v29 = vpop.eup %1911 }
0x11bf   :  { %v694_v30 = vadd.f32 1.0, %v1912_v29 }
0x11c1   :  { %1913 = vrcp.f32 %v694_v30 }
0x11cb   :  { %v1914_v31 = vpop.eup %1913 }
0x11cc   :  { %v698_v34 = vmul.f32 %v1914_v31, %v628_v14 }
0x122f   :  { %v701_v32 = vpop.permute.xlu0 %700 }
0x1230   :  { %v703_v33 = vmul.f32 %v1914_v31, %v701_v32 }
0x1232   :  { %705 = vrot.lane.b32.xlu1 %v703_v33, %s2116_s3 }
0x12a4   :  { %v706_v35 = vpop.permute.xlu1 %705 }
0x12a5   :  { %v708_v36 = vadd.f32 %v706_v35, %v698_v34 }
0x12a7   :  { %1915 = vtanh.f32 %v708_v36 }
0x12b1   :  { %v1916_v38 = vpop.eup %1915 }
0x12b2   :  { %711 = vrot.lane.b32.xlu0 %v1916_v38, %s2109_s21 }
0x1324   :  { %v712_v39 = vpop.permute.xlu0 %711 }
0x1325   :  { %v714_v40 = vmul.f32 %v1914_v31, %v712_v39 }
0x1327   :  { %v715_v41 = vpack.c.bf16 %v714_v40, %v714_v40 }
0x1329   :  { %725 = vrot.lane.b32.xlu1 %v715_v41, %s2116_s3  ;;  %v717_v5 = vrot.slane %v715_v41, 2 }
0x139b   :  { %v726_v42 = vpop.permute.xlu1 %725 }
0x139c   :  { %1758 = vmatmul.mubr.msk.bf16.vlgmr.msra.gmra.mrb[16].mxu0 %vm169_vm3, %v726_v42 }
0x139d   :  { %1773 = vmatprep.mubr.msk.bf16.mxu0 %vm2114_vm0, %v2113_v0  ;;  %1770 = vmatpush3.bf16.msra.mxu0 %v2369_v9 }
0x139e   :  { %1771 = vmatprep.subr.bf16.mxu0 %v2113_v0 }
0x13a1   :  { %1772 = vmatpush3.bf16.msra.mxu0 %v2372_v11 }
0x13a2   :  { %1785 = vmatprep.subr.bf16.mxu0 %v2113_v0 }
0x13a4   :  { %1774 = vmatmul.mubr.bf16.vlgmr.msra.gmra.mrb[20].mxu0 %v2115_v7 }
0x13a5   :  { %1786 = vmatpush3.bf16.msra.mxu0 %v2369_v9  ;;  %1789 = vmatprep.mubr.msk.bf16.mxu0 %vm2114_vm0, %v2113_v0 }
0x13a6   :  { %1787 = vmatprep.subr.bf16.mxu0 %v2113_v0 }
0x13a9   :  { %1788 = vmatpush3.bf16.msra.mxu0 %v2372_v11 }
0x13aa   :  { %1801 = vmatprep.subr.bf16.mxu0 %v2113_v0 }
0x146f   :  { %v764_v44 = vpop.f32.mrb[16].mxu0 }
0x1470   :  { %v770_v45 = vadd.f32 %v764_v44, %v724_v43  ;;  %v1759_v46 = vpop.f32.mrb[17].mxu0 }
0x1471   :  { %v767_v47 = vpop.f32.mrb[18].mxu0 }
0x1472   :  { %1917 = vtanh.f32 %v770_v45  ;;  %v1760_v48 = vpop.f32.mrb[19].mxu0  ;;  %v1609_v50 = vmul.f32 -1.442695, %v770_v45 }
0x1474   :  { %1919 = vpow2.f32 %v1609_v50 }
0x1477   :  { %v921_v18 = vpop.f32.mrb[20].mxu0 }
0x1478   :  { %v1775_v19 = vpop.f32.mrb[21].mxu0 }
0x1479   :  { %v924_v20 = vpop.f32.mrb[22].mxu0 }
0x147a   :  { %v1776_v21 = vpop.f32.mrb[23].mxu0 }
0x147c   :  { %v1918_v49 = vpop.eup %1917 }
0x147d   :  { %780 = vrot.lane.b32.xlu0 %v1918_v49, %s2109_s21 }
0x147e   :  { %v1920_v51 = vpop.eup %1919 }
0x147f   :  { %v774_v52 = vadd.f32 1.0, %v1920_v51 }
0x1481   :  { %1921 = vrcp.f32 %v774_v52 }
0x148b   :  { %v1922_v53 = vpop.eup %1921 }
0x148c   :  { %v778_v61 = vmul.f32 %v1922_v53, %v708_v36 }
0x14ef   :  { %v781_v54 = vpop.permute.xlu0 %780 }
0x14f0   :  { %v783_v56 = vmul.f32 %v1922_v53, %v781_v54 }
0x14f2   :  { %785 = vrot.lane.b32.xlu1 %v783_v56, %s2116_s3 }
0x14f6   :  { %318 = vrot.lane.b32.xlu1 %v317_v57, %s2116_s3 }
0x14fa   :  { %478 = vrot.lane.b32.xlu1 %v477_v58, %s2116_s3 }
0x14fe   :  { %638 = vrot.lane.b32.xlu1 %v637_v60, %s2116_s3 }
0x1564   :  { %v786_v62 = vpop.permute.xlu1 %785 }
0x1565   :  { %v788_v63 = vadd.f32 %v786_v62, %v778_v61 }
0x1567   :  { %1923 = vtanh.f32 %v788_v63 }
0x1568   :  { %v319_v1 = vpop.permute.xlu1 %318 }
0x1569   :  { %322 = vst.msk [vmem:[#allocation3] sm:$0x2] %vm321_vm4, %v319_v1 }
0x156c   :  { %v479_v2 = vpop.permute.xlu1 %478 }
0x156d   :  { %482 = vst.msk [vmem:[#allocation3] sm:$0x8] %vm481_vm5, %v479_v2 }
0x1570   :  { %v639_v55 = vpop.permute.xlu1 %638 }
0x1571   :  { %v1924_v3 = vpop.eup %1923  ;;  %642 = vst.msk [vmem:[#allocation3] sm:$0x20] %vm641_vm6, %v639_v55 }
0x1572   :  { %791 = vrot.lane.b32.xlu0 %v1924_v3, %s2109_s21 }
0x1576   :  { %398 = vrot.lane.b32.xlu0 %v397_v37, %s2116_s3 }
0x157a   :  { %558 = vrot.lane.b32.xlu0 %v557_v4, %s2116_s3 }
0x157e   :  { %718 = vrot.lane.b32.xlu0 %v717_v5, %s2116_s3 }
0x15e4   :  { %v792_v16 = vpop.permute.xlu0 %791 }
0x15e5   :  { %v794_v59 = vmul.f32 %v1922_v53, %v792_v16 }
0x15e7   :  { %v795_v6 = vpack.c.bf16 %v794_v59, %v794_v59 }
0x15e8   :  { %v399_v12 = vpop.permute.xlu0 %398 }
0x15e9   :  { %v797_v13 = vrot.slane %v795_v6, 1  ;;  %402 = vst.msk [vmem:[#allocation3] sm:$0x4] %vm401_vm7, %v399_v12 }
0x15eb   :  { %798 = vrot.lane.b32.xlu1 %v797_v13, %s2116_s3 }
0x15ec   :  { %v559_v14 = vpop.permute.xlu0 %558 }
0x15ed   :  { %562 = vst.msk [vmem:[#allocation3] sm:$0x10] %vm561_vm8, %v559_v14 }
0x15f0   :  { %v719_v7 = vpop.permute.xlu0 %718 }
0x15f1   :  { %722 = vst.msk [vmem:[#allocation3] sm:$0x40] %vm721_vm9, %v719_v7 }
0x165d   :  { %v799_v15 = vpop.permute.xlu1 %798 }
0x165e   :  { %802 = vst.msk [vmem:[#allocation3] sm:$0x80] %vm801_vm10, %v799_v15 }
0x1665   :  { %v812_v17 = vld [vmem:[#allocation3] sm:$0xff] }
0x1666   :  { %1766 = vmatmul.mubr.msk.bf16.vlgmr.msra.gmra.mrb[16].mxu1 %vm169_vm3, %v812_v17 }
0x1667   :  { %1778 = vmatpush3.bf16.msra.mxu1 %v2369_v9  ;;  %1781 = vmatprep.mubr.msk.bf16.mxu1 %vm2114_vm0, %v2113_v0 }
0x1668   :  { %1779 = vmatprep.subr.bf16.mxu1 %v2113_v0 }
0x166b   :  { %1780 = vmatpush3.bf16.msra.mxu1 %v2372_v11 }
0x166c   :  { %1793 = vmatprep.subr.bf16.mxu1 %v2113_v0 }
0x1739   :  { %v868_v23 = vpop.f32.mrb[16].mxu1 }
0x173a   :  { %v2397_v24 = vadd.f32 %v1610_v22, %v868_v23  ;;  %v1767_v25 = vpop.f32.mrb[17].mxu1 }
0x173b   :  { %v871_v26 = vpop.f32.mrb[18].mxu1 }
0x173c   :  { %v927_v27 = vadd.f32 %v921_v18, %v2397_v24  ;;  %v2400_v28 = vadd.f32 %v1610_v22, %v871_v26  ;;  %v1768_v29 = vpop.f32.mrb[19].mxu1 }
0x173e   :  { %1925 = vtanh.f32 %v927_v27  ;;  %v1616_v31 = vmul.f32 -1.442695, %v927_v27 }
0x1740   :  { %1927 = vpow2.f32 %v1616_v31 }
0x1748   :  { %v1926_v30 = vpop.eup %1925 }
0x1749   :  { %937 = vrot.lane.b32.xlu0 %v1926_v30, %s2109_s21 }
0x174a   :  { %v1928_v32 = vpop.eup %1927 }
0x174b   :  { %v931_v33 = vadd.f32 1.0, %v1928_v32 }
0x174d   :  { %1929 = vrcp.f32 %v931_v33 }
0x1757   :  { %v1930_v34 = vpop.eup %1929 }
0x1758   :  { %v935_v38 = vmul.f32 0.0, %v1930_v34 }
0x17bb   :  { %v938_v35 = vpop.permute.xlu0 %937 }
0x17bc   :  { %v940_v36 = vmul.f32 %v1930_v34, %v938_v35 }
0x17be   :  { %942 = vrot.lane.b32.xlu1 %v940_v36, %s2116_s3 }
0x1830   :  { %v943_v39 = vpop.permute.xlu1 %942 }
0x1831   :  { %v945_v40 = vadd.f32 %v943_v39, %v935_v38 }
0x1833   :  { %1931 = vtanh.f32 %v945_v40  ;;  %v1011_v61 = vrot.slane %v945_v40, 6 }
0x183d   :  { %v1932_v41 = vpop.eup %1931 }
0x183e   :  { %948 = vrot.lane.b32.xlu0 %v1932_v41, %s2109_s21 }
0x18b0   :  { %v949_v42 = vpop.permute.xlu0 %948 }
0x18b1   :  { %v951_v43 = vmul.f32 %v1930_v34, %v949_v42 }
0x18b3   :  { %v952_v44 = vpack.c.bf16 %v951_v43, %v951_v43 }
0x18b5   :  { %954 = vrot.lane.b32.xlu1 %v952_v44, %s2116_s3 }
0x1927   :  { %v955_v45 = vpop.permute.xlu1 %954 }
0x1928   :  { %1782 = vmatmul.mubr.msk.bf16.vlgmr.msra.gmra.mrb[20].mxu1 %vm169_vm3, %v955_v45 }
0x1929   :  { %1794 = vmatpush3.bf16.msra.mxu1 %v2369_v9  ;;  %1797 = vmatprep.mubr.msk.bf16.mxu1 %vm2114_vm0, %v2113_v0 }
0x192a   :  { %1795 = vmatprep.subr.bf16.mxu1 %v2113_v0 }
0x192d   :  { %1796 = vmatpush3.bf16.msra.mxu1 %v2372_v11 }
0x192e   :  { %1809 = vmatprep.subr.bf16.mxu1 %v2113_v0 }
0x19fb   :  { %v993_v46 = vpop.f32.mrb[20].mxu1 }
0x19fc   :  { %v1000_v47 = vrot.slane %v993_v46, 6  ;;  %v1783_v48 = vpop.f32.mrb[21].mxu1 }
0x19fd   :  { %v996_v49 = vpop.f32.mrb[22].mxu1 }
0x19fe   :  { %v1002_v50 = vadd.f32 %v1000_v47, %v2397_v24  ;;  %v1784_v51 = vpop.f32.mrb[23].mxu1 }
0x1a00   :  { %1933 = vtanh.f32 %v1002_v50  ;;  %v1618_v53 = vmul.f32 -1.442695, %v1002_v50 }
0x1a02   :  { %1935 = vpow2.f32 %v1618_v53 }
0x1a0a   :  { %v1934_v52 = vpop.eup %1933 }
0x1a0b   :  { %1015 = vrot.lane.b32.xlu0 %v1934_v52, %s2109_s21 }
0x1a0c   :  { %v1936_v54 = vpop.eup %1935 }
0x1a0d   :  { %v1006_v56 = vadd.f32 1.0, %v1936_v54 }
0x1a0f   :  { %1937 = vrcp.f32 %v1006_v56 }
0x1a19   :  { %v1938_v57 = vpop.eup %1937 }
0x1a1a   :  { %v1013_v62 = vmul.f32 %v1938_v57, %v1011_v61 }
0x1a7d   :  { %v1016_v58 = vpop.permute.xlu0 %1015 }
0x1a7e   :  { %v1018_v60 = vmul.f32 %v1938_v57, %v1016_v58 }
0x1a80   :  { %1020 = vrot.lane.b32.xlu1 %v1018_v60, %s2116_s3 }
0x1af2   :  { %v1021_v63 = vpop.permute.xlu1 %1020 }
0x1af3   :  { %v1023_v1 = vadd.f32 %v1021_v63, %v1013_v62 }
0x1af5   :  { %1939 = vtanh.f32 %v1023_v1  ;;  %v1090_v20 = vrot.slane %v1023_v1, 6 }
0x1aff   :  { %v1940_v2 = vpop.eup %1939 }
0x1b00   :  { %1026 = vrot.lane.b32.xlu0 %v1940_v2, %s2109_s21 }
0x1b72   :  { %v1027_v55 = vpop.permute.xlu0 %1026 }
0x1b73   :  { %v1029_v3 = vmul.f32 %v1938_v57, %v1027_v55 }
0x1b75   :  { %v1030_v37 = vpack.c.bf16 %v1029_v3, %v1029_v3 }
0x1b77   :  { %v1032_v4 = vrot.slane %v1030_v37, 1 }
0x1b79   :  { %1033 = vrot.lane.b32.xlu1 %v1032_v4, %s2116_s3 }
0x1beb   :  { %v1034_v5 = vpop.permute.xlu1 %1033 }
0x1bec   :  { %1790 = vmatmul.mubr.msk.bf16.vlgmr.msra.gmra.mrb[24].mxu0 %vm169_vm3, %v1034_v5 }
0x1bed   :  { %1802 = vmatpush3.bf16.msra.mxu0 %v2369_v9  ;;  %1805 = vmatprep.mubr.msk.bf16.mxu0 %vm2114_vm0, %v2113_v0 }
0x1bee   :  { %1803 = vmatprep.subr.bf16.mxu0 %v2113_v0 }
0x1bf1   :  { %1804 = vmatpush3.bf16.msra.mxu0 %v2372_v11 }
0x1bf2   :  { %1817 = vmatprep.subr.bf16.mxu0 %v2113_v0 }
0x1cbf   :  { %v1072_v8 = vpop.f32.mrb[24].mxu0 }
0x1cc0   :  { %v1079_v10 = vrot.slane %v1072_v8, 4  ;;  %v1791_v16 = vpop.f32.mrb[25].mxu0 }
0x1cc1   :  { %v1075_v59 = vpop.f32.mrb[26].mxu0 }
0x1cc2   :  { %v1081_v6 = vadd.f32 %v1079_v10, %v2397_v24  ;;  %v1792_v12 = vpop.f32.mrb[27].mxu0 }
0x1cc4   :  { %1941 = vtanh.f32 %v1081_v6  ;;  %v1620_v14 = vmul.f32 -1.442695, %v1081_v6 }
0x1cc6   :  { %1943 = vpow2.f32 %v1620_v14 }
0x1cce   :  { %v1942_v13 = vpop.eup %1941 }
0x1ccf   :  { %1094 = vrot.lane.b32.xlu0 %v1942_v13, %s2109_s21 }
0x1cd0   :  { %v1944_v7 = vpop.eup %1943 }
0x1cd1   :  { %v1085_v15 = vadd.f32 1.0, %v1944_v7 }
0x1cd3   :  { %1945 = vrcp.f32 %v1085_v15 }
0x1cdd   :  { %v1946_v17 = vpop.eup %1945 }
0x1cde   :  { %v1092_v21 = vmul.f32 %v1946_v17, %v1090_v20 }
0x1d41   :  { %v1095_v18 = vpop.permute.xlu0 %1094 }
0x1d42   :  { %v1097_v19 = vmul.f32 %v1946_v17, %v1095_v18 }
0x1d44   :  { %1099 = vrot.lane.b32.xlu1 %v1097_v19, %s2116_s3 }
0x1db6   :  { %v1100_v22 = vpop.permute.xlu1 %1099 }
0x1db7   :  { %v1102_v23 = vadd.f32 %v1100_v22, %v1092_v21 }
0x1db9   :  { %1947 = vtanh.f32 %v1102_v23  ;;  %v1169_v46 = vrot.slane %v1102_v23, 6 }
0x1dc3   :  { %v1948_v25 = vpop.eup %1947 }
0x1dc4   :  { %1105 = vrot.lane.b32.xlu0 %v1948_v25, %s2109_s21 }
0x1e36   :  { %v1106_v26 = vpop.permute.xlu0 %1105 }
0x1e37   :  { %v1108_v27 = vmul.f32 %v1946_v17, %v1106_v26 }
0x1e39   :  { %v1109_v29 = vpack.c.bf16 %v1108_v27, %v1108_v27 }
0x1e3b   :  { %v1111_v30 = vrot.slane %v1109_v29, 2 }
0x1e3d   :  { %1112 = vrot.lane.b32.xlu1 %v1111_v30, %s2116_s3 }
0x1eaf   :  { %v1113_v31 = vpop.permute.xlu1 %1112 }
0x1eb0   :  { %1798 = vmatmul.mubr.msk.bf16.vlgmr.msra.gmra.mrb[24].mxu1 %vm169_vm3, %v1113_v31 }
0x1eb1   :  { %1810 = vmatpush3.bf16.msra.mxu1 %v2369_v9  ;;  %1813 = vmatprep.mubr.msk.bf16.mxu1 %vm2114_vm0, %v2113_v0 }
0x1eb2   :  { %1811 = vmatprep.subr.bf16.mxu1 %v2113_v0 }
0x1eb5   :  { %1812 = vmatpush3.bf16.msra.mxu1 %v2372_v11 }
0x1eb6   :  { %1825 = vmatprep.subr.bf16.mxu1 %v2113_v0 }
0x1f83   :  { %v1151_v32 = vpop.f32.mrb[24].mxu1 }
0x1f84   :  { %v1158_v33 = vrot.slane %v1151_v32, 2  ;;  %v1799_v34 = vpop.f32.mrb[25].mxu1 }
0x1f85   :  { %v1154_v35 = vpop.f32.mrb[26].mxu1 }
0x1f86   :  { %v1160_v36 = vadd.f32 %v1158_v33, %v2397_v24  ;;  %v1800_v38 = vpop.f32.mrb[27].mxu1 }
0x1f88   :  { %1949 = vtanh.f32 %v1160_v36  ;;  %v1622_v40 = vmul.f32 -1.442695, %v1160_v36 }
0x1f8a   :  { %1951 = vpow2.f32 %v1622_v40 }
0x1f92   :  { %v1950_v39 = vpop.eup %1949 }
0x1f93   :  { %1173 = vrot.lane.b32.xlu0 %v1950_v39, %s2109_s21 }
0x1f94   :  { %v1952_v41 = vpop.eup %1951 }
0x1f95   :  { %v1164_v42 = vadd.f32 1.0, %v1952_v41 }
0x1f97   :  { %1953 = vrcp.f32 %v1164_v42 }
0x1fa1   :  { %v1954_v43 = vpop.eup %1953 }
0x1fa2   :  { %v1171_v47 = vmul.f32 %v1954_v43, %v1169_v46 }
0x2005   :  { %v1174_v44 = vpop.permute.xlu0 %1173 }
0x2006   :  { %v1176_v45 = vmul.f32 %v1954_v43, %v1174_v44 }
0x2008   :  { %1178 = vrot.lane.b32.xlu1 %v1176_v45, %s2116_s3 }
0x207a   :  { %v1179_v48 = vpop.permute.xlu1 %1178 }
0x207b   :  { %v1181_v49 = vadd.f32 %v1179_v48, %v1171_v47 }
0x207d   :  { %1955 = vtanh.f32 %v1181_v49  ;;  %v1245_v4 = vrot.slane %v1181_v49, 6 }
0x2087   :  { %v1956_v24 = vpop.eup %1955 }
0x2088   :  { %1184 = vrot.lane.b32.xlu0 %v1956_v24, %s2109_s21 }
0x20fa   :  { %v1185_v50 = vpop.permute.xlu0 %1184 }
0x20fb   :  { %v1187_v51 = vmul.f32 %v1954_v43, %v1185_v50 }
0x20fd   :  { %v1188_v52 = vpack.c.bf16 %v1187_v51, %v1187_v51 }
0x20ff   :  { %v1190_v53 = vrot.slane %v1188_v52, 3 }
0x2101   :  { %1191 = vrot.lane.b32.xlu1 %v1190_v53, %s2116_s3 }
0x2173   :  { %v1192_v54 = vpop.permute.xlu1 %1191 }
0x2174   :  { %1806 = vmatmul.mubr.msk.bf16.vlgmr.msra.gmra.mrb[28].mxu0 %vm169_vm3, %v1192_v54 }
0x2175   :  { %1818 = vmatpush3.bf16.msra.mxu0 %v2369_v9  ;;  %1821 = vmatprep.mubr.msk.bf16.mxu0 %vm2114_vm0, %v2113_v0 }
0x2176   :  { %1819 = vmatprep.subr.bf16.mxu0 %v2113_v0 }
0x2179   :  { %1820 = vmatpush3.bf16.msra.mxu0 %v2372_v11 }
0x217a   :  { %1833 = vmatprep.subr.bf16.mxu0 %v2113_v0 }
0x2247   :  { %v1230_v56 = vpop.f32.mrb[28].mxu0 }
0x2248   :  { %v1236_v57 = vadd.f32 %v1230_v56, %v2400_v28  ;;  %v1807_v58 = vpop.f32.mrb[29].mxu0 }
0x2249   :  { %v1233_v60 = vpop.f32.mrb[30].mxu0 }
0x224a   :  { %1957 = vtanh.f32 %v1236_v57  ;;  %v1808_v61 = vpop.f32.mrb[31].mxu0  ;;  %v1624_v63 = vmul.f32 -1.442695, %v1236_v57 }
0x224c   :  { %1959 = vpow2.f32 %v1624_v63 }
0x2254   :  { %v1958_v62 = vpop.eup %1957 }
0x2255   :  { %1249 = vrot.lane.b32.xlu0 %v1958_v62, %s2109_s21 }
0x2256   :  { %v1960_v1 = vpop.eup %1959 }
0x2257   :  { %v1240_v2 = vadd.f32 1.0, %v1960_v1 }
0x2259   :  { %1961 = vrcp.f32 %v1240_v2 }
0x2263   :  { %v1962_v55 = vpop.eup %1961 }
0x2264   :  { %v1247_v5 = vmul.f32 %v1962_v55, %v1245_v4 }
0x22c7   :  { %v1250_v3 = vpop.permute.xlu0 %1249 }
0x22c8   :  { %v1252_v37 = vmul.f32 %v1962_v55, %v1250_v3 }
0x22ca   :  { %1254 = vrot.lane.b32.xlu1 %v1252_v37, %s2116_s3 }
0x233c   :  { %v1255_v8 = vpop.permute.xlu1 %1254 }
0x233d   :  { %v1257_v10 = vadd.f32 %v1255_v8, %v1247_v5 }
0x233f   :  { %1963 = vtanh.f32 %v1257_v10 }
0x2349   :  { %v1964_v16 = vpop.eup %1963 }
0x234a   :  { %1260 = vrot.lane.b32.xlu0 %v1964_v16, %s2109_s21 }
0x23bc   :  { %v1261_v59 = vpop.permute.xlu0 %1260 }
0x23bd   :  { %v1263_v6 = vmul.f32 %v1962_v55, %v1261_v59 }
0x23bf   :  { %v1264_v12 = vpack.c.bf16 %v1263_v6, %v1263_v6 }
0x23c1   :  { %1266 = vrot.lane.b32.xlu1 %v1264_v12, %s2116_s3 }
0x2433   :  { %v1267_v13 = vpop.permute.xlu1 %1266 }
0x2434   :  { %1814 = vmatmul.mubr.msk.bf16.vlgmr.msra.gmra.mrb[28].mxu1 %vm169_vm3, %v1267_v13 }
0x2435   :  { %1826 = vmatpush3.bf16.msra.mxu1 %v2369_v9  ;;  %1829 = vmatprep.mubr.msk.bf16.mxu1 %vm2114_vm0, %v2113_v0 }
0x2436   :  { %1827 = vmatprep.subr.bf16.mxu1 %v2113_v0 }
0x2439   :  { %1828 = vmatpush3.bf16.msra.mxu1 %v2372_v11  ;;  %v1323_v11 = vrot.slane %v1257_v10, 6 }
0x2507   :  { %v1305_v14 = vpop.f32.mrb[28].mxu1 }
0x2508   :  { %v1312_v7 = vrot.slane %v1305_v14, 6  ;;  %v1815_v15 = vpop.f32.mrb[29].mxu1 }
0x2509   :  { %v1308_v17 = vpop.f32.mrb[30].mxu1 }
0x250a   :  { %v1314_v18 = vadd.f32 %v1312_v7, %v2400_v28  ;;  %v1816_v19 = vpop.f32.mrb[31].mxu1  ;;  %v1860_v7 = vld [vmem:[%s2506_s7 + $0x8] sm:$0xff]  }
0x250c   :  { %1965 = vtanh.f32 %v1314_v18  ;;  %v1626_v21 = vmul.f32 -1.442695, %v1314_v18 }
0x250e   :  { %1967 = vpow2.f32 %v1626_v21 }
0x2516   :  { %v1966_v20 = vpop.eup %1965 }
0x2517   :  { %1327 = vrot.lane.b32.xlu0 %v1966_v20, %s2109_s21 }
0x2518   :  { %v1968_v9 = vpop.eup %1967 }
0x2519   :  { %v1318_v22 = vadd.f32 1.0, %v1968_v9  ;;  %v1631_v9 = vld [vmem:[#allocation10] ss:$0 sm:$0xff] }
0x251b   :  { %1969 = vrcp.f32 %v1318_v22 }
0x2525   :  { %v1970_v23 = vpop.eup %1969 }
0x2526   :  { %v1325_v27 = vmul.f32 %v1970_v23, %v1323_v11 }
0x2589   :  { %v1328_v25 = vpop.permute.xlu0 %1327 }
0x258a   :  { %v1330_v26 = vmul.f32 %v1970_v23, %v1328_v25 }
0x258c   :  { %1332 = vrot.lane.b32.xlu1 %v1330_v26, %s2116_s3 }
0x25fe   :  { %v1333_v29 = vpop.permute.xlu1 %1332 }
0x25ff   :  { %v1335_v30 = vadd.f32 %v1333_v29, %v1325_v27 }
0x2601   :  { %1971 = vtanh.f32 %v1335_v30  ;;  %v1402_v50 = vrot.slane %v1335_v30, 6 }
0x260b   :  { %v1972_v31 = vpop.eup %1971 }
0x260c   :  { %1338 = vrot.lane.b32.xlu0 %v1972_v31, %s2109_s21 }
0x267e   :  { %v1339_v32 = vpop.permute.xlu0 %1338 }
0x267f   :  { %v1341_v33 = vmul.f32 %v1970_v23, %v1339_v32 }
0x2681   :  { %v1342_v34 = vpack.c.bf16 %v1341_v33, %v1341_v33 }
0x2683   :  { %v1344_v35 = vrot.slane %v1342_v34, 1 }
0x2685   :  { %1345 = vrot.lane.b32.xlu1 %v1344_v35, %s2116_s3 }
0x26f7   :  { %v1346_v36 = vpop.permute.xlu1 %1345 }
0x26f8   :  { %1822 = vmatmul.mubr.msk.bf16.vlgmr.msra.gmra.mrb[32].mxu0 %vm169_vm3, %v1346_v36 }
0x26f9   :  { %1837 = vmatprep.mubr.msk.bf16.mxu0 %vm2114_vm0, %v2113_v0 }
0x27cb   :  { %v1384_v38 = vpop.f32.mrb[32].mxu0 }
0x27cc   :  { %v1391_v39 = vrot.slane %v1384_v38, 4  ;;  %v1823_v40 = vpop.f32.mrb[33].mxu0 }
0x27cd   :  { %v1387_v41 = vpop.f32.mrb[34].mxu0 }
0x27ce   :  { %v1393_v42 = vadd.f32 %v1391_v39, %v2400_v28  ;;  %v1824_v43 = vpop.f32.mrb[35].mxu0 }
0x27d0   :  { %1973 = vtanh.f32 %v1393_v42  ;;  %v1628_v45 = vmul.f32 -1.442695, %v1393_v42 }
0x27d2   :  { %1975 = vpow2.f32 %v1628_v45 }
0x27da   :  { %v1974_v44 = vpop.eup %1973 }
0x27db   :  { %1406 = vrot.lane.b32.xlu0 %v1974_v44, %s2109_s21 }
0x27dc   :  { %v1976_v46 = vpop.eup %1975 }
0x27dd   :  { %v1397_v47 = vadd.f32 1.0, %v1976_v46 }
0x27df   :  { %1977 = vrcp.f32 %v1397_v47 }
0x27e9   :  { %v1978_v48 = vpop.eup %1977 }
0x27ea   :  { %v1404_v51 = vmul.f32 %v1978_v48, %v1402_v50 }
0x284d   :  { %v1407_v49 = vpop.permute.xlu0 %1406 }
0x284e   :  { %v1409_v24 = vmul.f32 %v1978_v48, %v1407_v49 }
0x2850   :  { %1411 = vrot.lane.b32.xlu1 %v1409_v24, %s2116_s3 }
0x28c2   :  { %v1412_v52 = vpop.permute.xlu1 %1411 }
0x28c3   :  { %v1414_v53 = vadd.f32 %v1412_v52, %v1404_v51 }
0x28c5   :  { %1979 = vtanh.f32 %v1414_v53  ;;  %v1481_v6 = vrot.slane %v1414_v53, 6 }
0x28cf   :  { %v1980_v54 = vpop.eup %1979 }
0x28d0   :  { %1417 = vrot.lane.b32.xlu0 %v1980_v54, %s2109_s21 }
0x2942   :  { %v1418_v56 = vpop.permute.xlu0 %1417 }
0x2943   :  { %v1420_v57 = vmul.f32 %v1978_v48, %v1418_v56 }
0x2945   :  { %v1421_v58 = vpack.c.bf16 %v1420_v57, %v1420_v57 }
0x2947   :  { %v1423_v60 = vrot.slane %v1421_v58, 2 }
0x2949   :  { %1424 = vrot.lane.b32.xlu1 %v1423_v60, %s2116_s3 }
0x29bb   :  { %v1425_v61 = vpop.permute.xlu1 %1424 }
0x29bc   :  { %1830 = vmatmul.mubr.msk.bf16.vlgmr.msra.gmra.mrb[32].mxu1 %vm169_vm3, %v1425_v61 }
0x2a8f   :  { %v1463_v62 = vpop.f32.mrb[32].mxu1 }
0x2a90   :  { %v1470_v63 = vrot.slane %v1463_v62, 2  ;;  %v1831_v1 = vpop.f32.mrb[33].mxu1 }
0x2a91   :  { %v1466_v2 = vpop.f32.mrb[34].mxu1 }
0x2a92   :  { %v1472_v55 = vadd.f32 %v1470_v63, %v2400_v28  ;;  %v1832_v3 = vpop.f32.mrb[35].mxu1  ;;  %v1859_v28 = vld [vmem:[%s2506_s7] sm:$0xff]   ;;  %s2077_s7 = scalar_lea.vmem %s1580_s29, 32 }
0x2a93   :  { %1834 = vmatpush3.bf16.msra.mxu0 %v1859_v28  ;;  %p2078_p4 = scmp.ne.s32.totalorder %s1580_s29, %s2077_s7  ;;  %p2083_p6 = scmp.lt.s32.totalorder %s2077_s7, %s2077_s7 }
0x2a94   :  { %1981 = vtanh.f32 %v1472_v55  ;;  %v1630_v4 = vmul.f32 -1.442695, %v1472_v55  ;;  %1835 = vmatprep.subr.bf16.mxu0 %v2113_v0 }
0x2a95   :  { %p2084_p7 = por %p2083_p6, %p2082_p5 }
0x2a96   :  { %1983 = vpow2.f32 %v1630_v4 }
0x2a97   :  { %1836 = vmatpush3.bf16.msra.mxu0 %v1860_v7  ;;  %p2085_p8 = pnand %p2084_p7, %p2078_p4 }
0x2a9e   :  { %v1982_v37 = vpop.eup %1981 }
0x2a9f   :  { %1485 = vrot.lane.b32.xlu0 %v1982_v37, %s2109_s21 }
0x2aa0   :  { %v1984_v5 = vpop.eup %1983 }
0x2aa1   :  { %v1476_v8 = vadd.f32 1.0, %v1984_v5 }
0x2aa3   :  { %1985 = vrcp.f32 %v1476_v8 }
0x2aad   :  { %v1986_v10 = vpop.eup %1985 }
0x2aae   :  { %v1483_v12 = vmul.f32 %v1986_v10, %v1481_v6 }
0x2b11   :  { %v1486_v16 = vpop.permute.xlu0 %1485 }
0x2b12   :  { %v1488_v59 = vmul.f32 %v1986_v10, %v1486_v16 }
0x2b14   :  { %1490 = vrot.lane.b32.xlu1 %v1488_v59, %s2116_s3 }
0x2b86   :  { %v1491_v13 = vpop.permute.xlu1 %1490 }
0x2b87   :  { %v1493_v14 = vadd.f32 %v1491_v13, %v1483_v12 }
0x2b89   :  { %1987 = vtanh.f32 %v1493_v14 }
0x2b93   :  { %v1988_v15 = vpop.eup %1987 }
0x2b94   :  { %1496 = vrot.lane.b32.xlu0 %v1988_v15, %s2109_s21 }
0x2c06   :  { %v1497_v17 = vpop.permute.xlu0 %1496 }
0x2c07   :  { %v1499_v18 = vmul.f32 %v1986_v10, %v1497_v17 }
0x2c09   :  { %v1505_v19 = vpack.c.bf16 %v1499_v18, %v1499_v18 }
0x2c0b   :  { %v1513_v20 = vrot.slane %v1505_v19, 3 }
0x2c0d   :  { %1514 = vrot.lane.b32.xlu1 %v1513_v20, %s2116_s3 }
0x2c7f   :  { %v1515_v21 = vpop.permute.xlu1 %1514 }
0x2c80   :  { %1838 = vmatmul.mubr.msk.bf16.vlgmr.msra.gmra.mrb[36].mxu0 %vm169_vm3, %v1515_v21 }
0x2d53   :  { %v1565_v22 = vpop.f32.mrb[36].mxu0 }
0x2d54   :  { %v1566_v23 = vadd.f32 %v1631_v9, %v1565_v22  ;;  %v1839_v0 = vpop.f32.mrb[37].mxu0 }
0x2d55   :  { %v1568_v25 = vpop.f32.mrb[38].mxu0 }
0x2d56   :  { %v1840_v26 = vpop.f32.mrb[39].mxu0  ;;  %1572 = vst.msk [vmem:[#allocation12] sm:$0x3] %vm1571_vm11, %v1566_v23 }
0x2d57   :  { %2088 = shalt.err (!%p2085_p8)
}
0x2d58   :  { %s2089_s11 = scalar_lea.hbm %s2508_s9, 32 }
0x2d59   :  { %p2090_p9 = scmp.ne.s32.totalorder %s2508_s9, %s2089_s11  ;;  %p2093_p10 = scmp.lt.u32.totalorder %s2089_s11, %s2508_s9 }
0x2d5b   :  { %p2095_p11 = pnand %p2093_p10, %p2090_p9 }
0x2d5d   :  { %2098 = shalt.err (!%p2095_p11)
}
0x2d5e   :  { %1582 = dma.vmem_to_hbm [thread:$0]  %s1580_s29, 32, %s2508_s9, [#allocation6]  }
0x2d5f   :  { %2105 = dma.done.wait [#allocation6], 32  }
0x2d60   :  { %2106 = vsyncadd [#allocation6], 4294967264 }
0x2d61   :  { %1586 = vsyncpa [#allocation5], 1 }
0x2d62   :  { %1587 = vsyncpa [#allocation8], 1 }
0x2d63   :  { %1588 = vsyncpa [#allocation11], 1 }
0x2d64   :  { %1589 = vsyncpa [#allocation6], 1 }

</bundles_post_ra>
